<compile_context>
chip_gen: v7x
topology: tpu7x:2x2x1
jax: 0.10.0
libtpu: 0.0.40
codegen_flags: <defaults>
</compile_context>

<pallas_src>
import jax
import jax.numpy as jnp
from jax.experimental import pallas as pl
from jax.experimental.pallas import tpu as pltpu


def dnn_gate_kernel(x_ref, w_ref, b_ref, o_ref):
    # x_ref: (B, K) f32   w_ref: (K, N) bf16
    # b_ref: (1, N) f32   o_ref: (B, N) f32
    x_bf = x_ref[...].astype(jnp.bfloat16)          # cast in VMEM, no extra HBM pass
    y = jnp.dot(x_bf, w_ref[...], preferred_element_type=jnp.float32)
    o_ref[...] = jax.nn.sigmoid(y + b_ref[...]).astype(o_ref.dtype)


def prepare_dnn_gate_params(w_t, b):
    """One-time parameter prep (hoisted out of the forward): bf16 weight, f32 bias row."""
    w_bf = w_t.astype(jnp.bfloat16)                 # (K, N) bf16, stays un-padded in HBM
    b_f32 = b.astype(jnp.float32).reshape(1, -1)    # (1, N) f32
    return w_bf, b_f32


@jax.jit
def dnn_gate_forward(x, w_bf, b_f32):
    """x: (B, K) f32, w_bf: (K, N) bf16 (transposed Linear weight), b_f32: (1, N) f32."""
    B, K = x.shape
    K2, N = w_bf.shape
    assert K == K2 and b_f32.shape == (1, N)

    cost = pl.CostEstimate(
        flops=2 * B * K * N,
        transcendentals=B * N,
        bytes_accessed=B * K * 4 + K * N * 2 + N * 4 + B * N * 4,
    )

    return pl.pallas_call(
        dnn_gate_kernel,
        out_shape=jax.ShapeDtypeStruct((B, N), jnp.float32),
        grid=(1,),
        in_specs=[
            pl.BlockSpec((B, K), lambda i: (0, 0)),   # whole activation
            pl.BlockSpec((K, N), lambda i: (0, 0)),   # whole weight (un-padded N)
            pl.BlockSpec((1, N), lambda i: (0, 0)),   # bias
        ],
        out_specs=pl.BlockSpec((B, N), lambda i: (0, 0)),
        compiler_params=pltpu.CompilerParams(
            dimension_semantics=("arbitrary",)),
        cost_estimate=cost,
    )(x, w_bf, b_f32)


def init_dnn_gate_params(key, in_features, out_features):
    """Deterministic init mimicking torch.nn.Linear default (uniform +-1/sqrt(in))."""
    k_w, k_b = jax.random.split(key)
    bound = 1.0 / jnp.sqrt(jnp.float32(in_features))
    # PyTorch stores weight as (out, in); we keep the transposed (in, out) layout.
    w_t = jax.random.uniform(
        k_w, (in_features, out_features), jnp.float32, -bound, bound)
    b = jax.random.uniform(
        k_b, (out_features,), jnp.float32, -bound, bound)
    return w_t, b


if __name__ == "__main__":
    # Module defaults: in_features = 256*6*6 = 9216, out_features = 2.
    in_features = 256 * 6 * 6
    out_features = 2
    batch = 2

    key = jax.random.PRNGKey(0)
    k_x, k_p = jax.random.split(key)
    x = jax.random.normal(k_x, (batch, in_features), jnp.float32)
    w_t, b = init_dnn_gate_params(k_p, in_features, out_features)

    # One-time parameter preparation (cast hoisted out of the forward).
    w_bf, b_f32 = prepare_dnn_gate_params(w_t, b)

    out = dnn_gate_forward(x, w_bf, b_f32)
    out = jax.block_until_ready(out)

    # Reference matching the kernel's bf16-input / f32-accumulate math.
    x_ref_bf = x.astype(jnp.bfloat16).astype(jnp.float32)
    w_ref_bf = w_t.astype(jnp.bfloat16).astype(jnp.float32)
    ref_bf16_inputs = jax.nn.sigmoid(x_ref_bf @ w_ref_bf + b)
    # Full-precision reference (torch semantics): sigmoid(x @ W.T + b).
    ref_f32 = jax.nn.sigmoid(x @ w_t + b)

    assert out.shape == (batch, out_features)
    assert jnp.allclose(out, ref_bf16_inputs, atol=2e-3, rtol=2e-3)
    assert jnp.allclose(out, ref_f32, atol=2e-2, rtol=2e-2)

    print("KERNEL_OK")
</pallas_src>

<mosaic_0001>
module attributes {stable_mosaic.version = 11 : i64} {
  func.func @dnn_gate_kernel(%arg0: i32, %arg1: memref<2x9216xf32, #tpu.memory_space<vmem>>, %arg2: memref<9216x2xbf16, #tpu.memory_space<vmem>>, %arg3: memref<1x2xf32, #tpu.memory_space<vmem>>, %arg4: memref<2x2xf32, #tpu.memory_space<vmem>>) attributes {dimension_semantics = [#tpu.dimension_semantics<arbitrary>], iteration_bounds = array<i64: 1>, scalar_prefetch = 0 : i64, scratch_operands = 0 : i64, tpu.core_type = #tpu.core_type<tc>, window_params = [{pipeline_mode = #tpu.pipeline_mode<synchronous>, transform_indices = @transform_0, window_bounds = array<i64: 2, 9216>}, {pipeline_mode = #tpu.pipeline_mode<synchronous>, transform_indices = @transform_1, window_bounds = array<i64: 9216, 2>}, {pipeline_mode = #tpu.pipeline_mode<synchronous>, transform_indices = @transform_2, window_bounds = array<i64: 1, 2>}, {pipeline_mode = #tpu.pipeline_mode<synchronous>, transform_indices = @transform_3, window_bounds = array<i64: 2, 2>}]} {
    %c0 = arith.constant 0 : index
    %c0_0 = arith.constant 0 : index
    %0 = vector.load %arg1[%c0, %c0_0] : memref<2x9216xf32, #tpu.memory_space<vmem>>, vector<2x9216xf32>
    %1 = arith.truncf %0 : vector<2x9216xf32> to vector<2x9216xbf16>
    %c0_1 = arith.constant 0 : index
    %c0_2 = arith.constant 0 : index
    %2 = vector.load %arg2[%c0_1, %c0_2] : memref<9216x2xbf16, #tpu.memory_space<vmem>>, vector<9216x2xbf16>
    %cst = arith.constant dense<0.000000e+00> : vector<2x2xf32>
    %3 = tpu.matmul %1, %2, %cst {dimension_numbers = #tpu.dot_dimension_numbers<[1], [0], [0], [1], [0, 0, 1, 1], [], []>} : vector<2x9216xbf16>, vector<9216x2xbf16>, vector<2x2xf32> -> vector<2x2xf32>
    %c0_3 = arith.constant 0 : index
    %c0_4 = arith.constant 0 : index
    %4 = vector.load %arg3[%c0_3, %c0_4] : memref<1x2xf32, #tpu.memory_space<vmem>>, vector<1x2xf32>
    %5 = vector.broadcast %4 : vector<1x2xf32> to vector<2x2xf32>
    %6 = arith.addf %3, %5 : vector<2x2xf32>
    %7 = arith.negf %6 : vector<2x2xf32>
    %8 = math.exp %7 : vector<2x2xf32>
    %cst_5 = arith.constant 1.000000e+00 : f32
    %9 = vector.broadcast %cst_5 : f32 to vector<2x2xf32>
    %10 = arith.addf %9, %8 : vector<2x2xf32>
    %11 = arith.divf %9, %10 : vector<2x2xf32>
    %c0_6 = arith.constant 0 : index
    %c0_7 = arith.constant 0 : index
    %12 = vector.load %arg4[%c0_6, %c0_7] : memref<2x2xf32, #tpu.memory_space<vmem>>, vector<2x2xf32>
    tpu.vector_store %arg4[%c0_6, %c0_7], %11 {strides = array<i32>} : memref<2x2xf32, #tpu.memory_space<vmem>>, vector<2x2xf32>,
    return
  }
  func.func @transform_0(%arg0: i32) -> (i32, i32) {
    %c0_i32 = arith.constant 0 : i32
    %c0_i32_0 = arith.constant 0 : i32
    %c0_i32_1 = arith.constant 0 : i32
    return %c0_i32, %c0_i32_0 : i32, i32
  }
  func.func @transform_1(%arg0: i32) -> (i32, i32) {
    %c0_i32 = arith.constant 0 : i32
    %c0_i32_0 = arith.constant 0 : i32
    %c0_i32_1 = arith.constant 0 : i32
    return %c0_i32, %c0_i32_0 : i32, i32
  }
  func.func @transform_2(%arg0: i32) -> (i32, i32) {
    %c0_i32 = arith.constant 0 : i32
    %c0_i32_0 = arith.constant 0 : i32
    %c0_i32_1 = arith.constant 0 : i32
    return %c0_i32, %c0_i32_0 : i32, i32
  }
  func.func @transform_3(%arg0: i32) -> (i32, i32) {
    %c0_i32 = arith.constant 0 : i32
    %c0_i32_0 = arith.constant 0 : i32
    %c0_i32_1 = arith.constant 0 : i32
    return %c0_i32, %c0_i32_0 : i32, i32
  }
}

</mosaic_0001>

<bundles_post_ra>
// kernel: dnn_gate_forward.1
= control target key start
LH: loop header
LB: loop body
LE: loop exit
PB: predicated region body
PF: predicated region fallthrough
CT: control target
= control target key end

     0   :  { %v56_v28 = vlaneseq  ;;  %v8573_v36 = vmov 1983009808   ;;  %s10460_s0 = inlined_call_operand.vmem [shape: f32[2,9216], index: 0, kind: input, shape index: {}]   ;;  %s10461_s1 = inlined_call_operand.vmem [shape: bf16[9216,2], index: 1, kind: input, shape index: {}]   ;;  %s10462_s2 = inlined_call_operand.vmem [shape: f32[1,2], index: 2, kind: input, shape index: {}]   ;;  %s10463_s3 = inlined_call_operand.hbm [shape: f32[2,2], index: 3, kind: output, shape index: {}]  }
   0x1   :  { %v7951_v0 = vld [vmem:[%s10461_s1 + $0x40] sm:$0xff]   ;;  %v7955_v4 = vld [vmem:[%s10461_s1 + $0x48] sm:$0xff]   ;;  %v7959_v8 = vld [vmem:[%s10461_s1 + $0x50] sm:$0xff]   ;;  %v54_v37 = vunpack.c.l.s4 %v8573_v36 }
   0x2   :  { %v7952_v1 = vld [vmem:[%s10461_s1 + $0xc0] sm:$0xff]   ;;  %7157 = vmatprep.subr.bf16.mxu0 %v7951_v0  ;;  %v7956_v5 = vld [vmem:[%s10461_s1 + $0xc8] sm:$0xff]   ;;  %v7960_v9 = vld [vmem:[%s10461_s1 + $0xd0] sm:$0xff]   ;;  %v57_v33 = vshrl.u32 %v56_v28, 7 }
   0x3   :  { %v7953_v2 = vld [vmem:[%s10461_s1] sm:$0xff]   ;;  %7179 = vmatprep.subr.bf16.mxu1 %v7952_v1  ;;  %v7957_v6 = vld [vmem:[%s10461_s1 + $0x8] sm:$0xff]   ;;  %v7961_v10 = vld [vmem:[%s10461_s1 + $0x10] sm:$0xff]   ;;  %v55_v39 = vunpack.c.0.s8 %v54_v37 }
   0x4   :  { %v7954_v3 = vld [vmem:[%s10461_s1 + $0x80] sm:$0xff]   ;;  %7158 = vmatpush3.bf16.msra.mxu0 %v7953_v2  ;;  %v7958_v7 = vld [vmem:[%s10461_s1 + $0x88] sm:$0xff]   ;;  %v7962_v11 = vld [vmem:[%s10461_s1 + $0x90] sm:$0xff]  }
   0x5   :  { %7180 = vmatpush3.bf16.msra.mxu1 %v7954_v3  ;;  %7159 = vmatprep.subr.bf16.mxu0 %v7955_v4  ;;  %v7963_v12 = vld [vmem:[%s10461_s1 + $0x58] sm:$0xff]   ;;  %v7967_v16 = vld [vmem:[%s10461_s1 + $0x60] sm:$0xff]   ;;  %v7971_v20 = vld [vmem:[%s10461_s1 + $0x68] sm:$0xff]   ;;  %v8700_v41 = vsub.s32 %v55_v39, %v57_v33 }
   0x6   :  { %7181 = vmatprep.subr.bf16.mxu1 %v7956_v5  ;;  %v7964_v13 = vld [vmem:[%s10461_s1 + $0xd8] sm:$0xff]   ;;  %v7968_v17 = vld [vmem:[%s10461_s1 + $0xe0] sm:$0xff]   ;;  %v7972_v21 = vld [vmem:[%s10461_s1 + $0xe8] sm:$0xff]  }
   0x7   :  { %v7965_v14 = vld [vmem:[%s10461_s1 + $0x18] sm:$0xff]   ;;  %v7969_v18 = vld [vmem:[%s10461_s1 + $0x20] sm:$0xff]   ;;  %v7973_v22 = vld [vmem:[%s10461_s1 + $0x28] sm:$0xff]  }
   0x8   :  { %7160 = vmatpush3.bf16.msra.mxu0 %v7957_v6  ;;  %v7966_v15 = vld [vmem:[%s10461_s1 + $0x98] sm:$0xff]   ;;  %v7970_v19 = vld [vmem:[%s10461_s1 + $0xa0] sm:$0xff]   ;;  %v7974_v23 = vld [vmem:[%s10461_s1 + $0xa8] sm:$0xff]  }
   0x9   :  { %7182 = vmatpush3.bf16.msra.mxu1 %v7958_v7  ;;  %7161 = vmatprep.subr.bf16.mxu0 %v7959_v8  ;;  %v7975_v24 = vld [vmem:[%s10461_s1 + $0x70] sm:$0xff]   ;;  %v7979_v29 = vld [vmem:[%s10461_s1 + $0x78] sm:$0xff]   ;;  %v16_v34 = vld [vmem:[%s10460_s0] sm:$0xff] }
   0xa   :  { %7183 = vmatprep.subr.bf16.mxu1 %v7960_v9  ;;  %v7976_v25 = vld [vmem:[%s10461_s1 + $0xf0] sm:$0xff]   ;;  %v7980_v30 = vld [vmem:[%s10461_s1 + $0xf8] sm:$0xff]   ;;  %v7984_v35 = vld [vmem:[%s10461_s1 + $0x140] sm:$0xff]   ;;  %v52_v40 = vcombine.high %v16_v34, %v16_v34  ;;  %v59_v42 = vrot.slane %v16_v34, %v8700_v41 }
   0xb   :  { %v7977_v26 = vld [vmem:[%s10461_s1 + $0x30] sm:$0xff]   ;;  %v7981_v31 = vld [vmem:[%s10461_s1 + $0x38] sm:$0xff]   ;;  %v7985_v38 = vld [vmem:[%s10461_s1 + $0x1c0] sm:$0xff]  }
   0xc   :  { %7162 = vmatpush3.bf16.msra.mxu0 %v7961_v10  ;;  %v7978_v27 = vld [vmem:[%s10461_s1 + $0xb0] sm:$0xff]   ;;  %v7982_v32 = vld [vmem:[%s10461_s1 + $0xb8] sm:$0xff]   ;;  %v66_v43 = vrot.slane %v52_v40, %v8700_v41  ;;  %v67_v44 = vcombine.high %v59_v42, %v59_v42  ;;  %v7986_v46 = vld [vmem:[%s10461_s1 + $0x100] sm:$0xff]   ;;  %v430_v47 = vpack.c.bf16 %v59_v42, %v59_v42 }
   0xd   :  { %7184 = vmatpush3.bf16.msra.mxu1 %v7962_v11  ;;  %7163 = vmatprep.subr.bf16.mxu0 %v7963_v12  ;;  %v7987_v49 = vld [vmem:[%s10461_s1 + $0x180] sm:$0xff]   ;;  %v7988_v52 = vld [vmem:[%s10461_s1 + $0x148] sm:$0xff]   ;;  %v7992_v56 = vld [vmem:[%s10461_s1 + $0x150] sm:$0xff]  }
   0xe   :  { %7185 = vmatprep.subr.bf16.mxu1 %v7964_v13  ;;  %v68_v45 = vcombine.high %v66_v43, %v66_v43  ;;  %v432_v48 = vpack.c.bf16 %v66_v43, %v66_v43  ;;  %v431_v50 = vpack.c.bf16 %v67_v44, %v67_v44  ;;  %v7989_v53 = vld [vmem:[%s10461_s1 + $0x1c8] sm:$0xff]   ;;  %v7993_v57 = vld [vmem:[%s10461_s1 + $0x1d0] sm:$0xff]   ;;  %v7996_v60 = vld [vmem:[%s10461_s1 + $0x158] sm:$0xff]  }
   0xf   :  { %v7990_v54 = vld [vmem:[%s10461_s1 + $0x108] sm:$0xff]   ;;  %v7994_v58 = vld [vmem:[%s10461_s1 + $0x110] sm:$0xff]   ;;  %v7997_v61 = vld [vmem:[%s10461_s1 + $0x1d8] sm:$0xff]  }
  0x10   :  { %7164 = vmatpush3.bf16.msra.mxu0 %v7965_v14  ;;  %v433_v51 = vpack.c.bf16 %v68_v45, %v68_v45  ;;  %5149 = vmatprep.mubr.bf16.mxu0 %v431_v50  ;;  %v7991_v55 = vld [vmem:[%s10461_s1 + $0x188] sm:$0xff]   ;;  %v7995_v59 = vld [vmem:[%s10461_s1 + $0x190] sm:$0xff]   ;;  %v7998_v62 = vld [vmem:[%s10461_s1 + $0x118] sm:$0xff]  }
  0x11   :  { %7186 = vmatpush3.bf16.msra.mxu1 %v7966_v15  ;;  %7165 = vmatprep.subr.bf16.mxu0 %v7967_v16  ;;  %v7999_v63 = vld [vmem:[%s10461_s1 + $0x198] sm:$0xff]   ;;  %v8000_v0 = vld [vmem:[%s10461_s1 + $0x160] sm:$0xff]   ;;  %v8004_v4 = vld [vmem:[%s10461_s1 + $0x168] sm:$0xff]  }
  0x12   :  { %7187 = vmatprep.subr.bf16.mxu1 %v7968_v17  ;;  %5189 = vmatprep.mubr.bf16.mxu1 %v433_v51  ;;  %v8001_v1 = vld [vmem:[%s10461_s1 + $0x1e0] sm:$0xff]   ;;  %v8005_v5 = vld [vmem:[%s10461_s1 + $0x1e8] sm:$0xff]   ;;  %v8008_v8 = vld [vmem:[%s10461_s1 + $0x170] sm:$0xff]  }
  0x13   :  { %v8002_v2 = vld [vmem:[%s10461_s1 + $0x120] sm:$0xff]   ;;  %v8006_v6 = vld [vmem:[%s10461_s1 + $0x128] sm:$0xff]   ;;  %v8009_v9 = vld [vmem:[%s10461_s1 + $0x1f0] sm:$0xff]  }
  0x14   :  { %7166 = vmatpush3.bf16.msra.mxu0 %v7969_v18  ;;  %v8003_v3 = vld [vmem:[%s10461_s1 + $0x1a0] sm:$0xff]   ;;  %v8007_v7 = vld [vmem:[%s10461_s1 + $0x1a8] sm:$0xff]   ;;  %v8010_v11 = vld [vmem:[%s10461_s1 + $0x130] sm:$0xff]  }
  0x15   :  { %7188 = vmatpush3.bf16.msra.mxu1 %v7970_v19  ;;  %7167 = vmatprep.subr.bf16.mxu0 %v7971_v20  ;;  %v17_v10 = vld [vmem:[%s10460_s0 + $0x8] sm:$0xff]  ;;  %v8011_v14 = vld [vmem:[%s10461_s1 + $0x1b0] sm:$0xff]   ;;  %v8012_v15 = vld [vmem:[%s10461_s1 + $0x178] sm:$0xff]  }
  0x16   :  { %7189 = vmatprep.subr.bf16.mxu1 %v7972_v21  ;;  %v76_v12 = vrot.slane %v17_v10, %v8700_v41  ;;  %v69_v13 = vcombine.high %v17_v10, %v17_v10  ;;  %v8013_v18 = vld [vmem:[%s10461_s1 + $0x1f8] sm:$0xff]   ;;  %v8024_v33 = vld [vmem:[%s10461_s1 + $0x288] sm:$0xff]   ;;  %v8025_v34 = vld [vmem:[%s10461_s1 + $0x250] sm:$0xff]  }
  0x17   :  { %v8014_v19 = vld [vmem:[%s10461_s1 + $0x138] sm:$0xff]   ;;  %v8027_v36 = vld [vmem:[%s10461_s1 + $0x210] sm:$0xff]   ;;  %v8033_v43 = vld [vmem:[%s10461_s1 + $0x260] sm:$0xff]  }
  0x18   :  { %7168 = vmatpush3.bf16.msra.mxu0 %v7973_v22  ;;  %v84_v16 = vcombine.high %v76_v12, %v76_v12  ;;  %v83_v17 = vrot.slane %v69_v13, %v8700_v41  ;;  %v8015_v22 = vld [vmem:[%s10461_s1 + $0x1b8] sm:$0xff]   ;;  %v8028_v37 = vld [vmem:[%s10461_s1 + $0x290] sm:$0xff]   ;;  %v8034_v44 = vld [vmem:[%s10461_s1 + $0x2e0] sm:$0xff]  }
  0x19   :  { %7190 = vmatpush3.bf16.msra.mxu1 %v7974_v23  ;;  %7169 = vmatprep.subr.bf16.mxu0 %v7975_v24  ;;  %v8017_v24 = vld [vmem:[%s10461_s1 + $0x240] sm:$0xff]   ;;  %v8030_v39 = vld [vmem:[%s10461_s1 + $0x2d8] sm:$0xff]   ;;  %v8040_v50 = vld [vmem:[%s10461_s1 + $0x2a8] sm:$0xff]  }
  0x1a   :  { %7191 = vmatprep.subr.bf16.mxu1 %v7976_v25  ;;  %v435_v20 = vpack.c.bf16 %v84_v16, %v84_v16  ;;  %v85_v21 = vcombine.high %v83_v17, %v83_v17  ;;  %v8018_v25 = vld [vmem:[%s10461_s1 + $0x2c0] sm:$0xff]   ;;  %v436_v28 = vpack.c.bf16 %v83_v17, %v83_v17  ;;  %v8031_v40 = vld [vmem:[%s10461_s1 + $0x218] sm:$0xff]   ;;  %v8041_v51 = vld [vmem:[%s10461_s1 + $0x270] sm:$0xff]  }
  0x1b   :  { %v8032_v42 = vld [vmem:[%s10461_s1 + $0x298] sm:$0xff]   ;;  %v8035_v45 = vld [vmem:[%s10461_s1 + $0x220] sm:$0xff]   ;;  %v8055_v10 = vld [vmem:[%s10461_s1 + $0x3c8] sm:$0xff]  }
  0x1c   :  { %7170 = vmatpush3.bf16.msra.mxu0 %v7977_v26  ;;  %v437_v23 = vpack.c.bf16 %v85_v21, %v85_v21  ;;  %v8019_v26 = vld [vmem:[%s10461_s1 + $0x200] sm:$0xff]   ;;  %v8058_v13 = vld [vmem:[%s10461_s1 + $0x350] sm:$0xff]   ;;  %v8062_v17 = vld [vmem:[%s10461_s1 + $0x358] sm:$0xff]  }
  0x1d   :  { %7192 = vmatpush3.bf16.msra.mxu1 %v7978_v27  ;;  %7171 = vmatprep.subr.bf16.mxu0 %v7979_v29  ;;  %v434_v27 = vpack.c.bf16 %v76_v12, %v76_v12  ;;  %v8020_v29 = vld [vmem:[%s10461_s1 + $0x280] sm:$0xff]   ;;  %v8057_v12 = vld [vmem:[%s10461_s1 + $0x388] sm:$0xff]   ;;  %v8061_v16 = vld [vmem:[%s10461_s1 + $0x390] sm:$0xff]  }
  0x1e   :  { %7193 = vmatprep.subr.bf16.mxu1 %v7980_v30  ;;  %v8021_v30 = vld [vmem:[%s10461_s1 + $0x248] sm:$0xff]   ;;  %v8066_v21 = vld [vmem:[%s10461_s1 + $0x360] sm:$0xff]  }
  0x20   :  { %7172 = vmatpush3.bf16.msra.mxu0 %v7981_v31  ;;  %v8022_v31 = vld [vmem:[%s10461_s1 + $0x2c8] sm:$0xff]  }
  0x21   :  { %7194 = vmatpush3.bf16.msra.mxu1 %v7982_v32  ;;  %7201 = vmatprep.subr.bf16.mxu0 %v7984_v35  ;;  %v8023_v32 = vld [vmem:[%s10461_s1 + $0x208] sm:$0xff]   ;;  %v8026_v35 = vld [vmem:[%s10461_s1 + $0x2d0] sm:$0xff]  }
  0x22   :  { %7223 = vmatprep.subr.bf16.mxu1 %v7985_v38  ;;  %v8029_v38 = vld [vmem:[%s10461_s1 + $0x258] sm:$0xff]  }
  0x23   :  { %5150 = vmatmul.mubr.bf16.vlgmr.msra.gmra.mrb[0].mxu0 %v430_v47  ;;  %v8037_v47 = vld [vmem:[%s10461_s1 + $0x268] sm:$0xff]  }
  0x24   :  { %5190 = vmatmul.mubr.bf16.vlgmr.msra.gmra.mrb[0].mxu1 %v432_v48  ;;  %7202 = vmatpush3.bf16.msra.mxu0 %v7986_v46  ;;  %v8036_v46 = vld [vmem:[%s10461_s1 + $0x2a0] sm:$0xff]   ;;  %v8038_v48 = vld [vmem:[%s10461_s1 + $0x2e8] sm:$0xff]  }
  0x25   :  { %7224 = vmatpush3.bf16.msra.mxu1 %v7987_v49  ;;  %7203 = vmatprep.subr.bf16.mxu0 %v7988_v52  ;;  %v8039_v49 = vld [vmem:[%s10461_s1 + $0x228] sm:$0xff]   ;;  %v8042_v52 = vld [vmem:[%s10461_s1 + $0x2f0] sm:$0xff]  }
  0x26   :  { %7225 = vmatprep.subr.bf16.mxu1 %v7989_v53  ;;  %5229 = vmatprep.mubr.bf16.mxu0 %v435_v20  ;;  %v18_v53 = vld [vmem:[%s10460_s0 + $0x10] sm:$0xff]  ;;  %v8065_v20 = vld [vmem:[%s10461_s1 + $0x398] sm:$0xff]  }
  0x27   :  { %5269 = vmatprep.mubr.bf16.mxu1 %v437_v23  ;;  %v8068_v23 = vld [vmem:[%s10461_s1 + $0x320] sm:$0xff]  }
  0x28   :  { %7204 = vmatpush3.bf16.msra.mxu0 %v7990_v54  ;;  %v8043_v54 = vld [vmem:[%s10461_s1 + $0x230] sm:$0xff]  }
  0x29   :  { %7226 = vmatpush3.bf16.msra.mxu1 %v7991_v55  ;;  %7205 = vmatprep.subr.bf16.mxu0 %v7992_v56  ;;  %v93_v55 = vrot.slane %v18_v53, %v8700_v41  ;;  %v86_v56 = vcombine.high %v18_v53, %v18_v53  ;;  %v8088_v53 = vld [vmem:[%s10461_s1 + $0x4c8] sm:$0xff]  }
  0x2a   :  { %7227 = vmatprep.subr.bf16.mxu1 %v7993_v57  ;;  %v8044_v57 = vld [vmem:[%s10461_s1 + $0x2b0] sm:$0xff]  }
  0x2c   :  { %7206 = vmatpush3.bf16.msra.mxu0 %v7994_v58  ;;  %v8045_v58 = vld [vmem:[%s10461_s1 + $0x278] sm:$0xff]  }
  0x2d   :  { %7228 = vmatpush3.bf16.msra.mxu1 %v7995_v59  ;;  %7207 = vmatprep.subr.bf16.mxu0 %v7996_v60  ;;  %v101_v59 = vcombine.high %v93_v55, %v93_v55  ;;  %v100_v60 = vrot.slane %v86_v56, %v8700_v41  ;;  %v8091_v56 = vld [vmem:[%s10461_s1 + $0x450] sm:$0xff]  }
  0x2e   :  { %7229 = vmatprep.subr.bf16.mxu1 %v7997_v61  ;;  %v8046_v61 = vld [vmem:[%s10461_s1 + $0x2f8] sm:$0xff]  }
  0x30   :  { %7208 = vmatpush3.bf16.msra.mxu0 %v7998_v62  ;;  %v8047_v62 = vld [vmem:[%s10461_s1 + $0x238] sm:$0xff]  }
  0x31   :  { %7230 = vmatpush3.bf16.msra.mxu1 %v7999_v63  ;;  %7209 = vmatprep.subr.bf16.mxu0 %v8000_v0  ;;  %v439_v63 = vpack.c.bf16 %v101_v59, %v101_v59  ;;  %v102_v0 = vcombine.high %v100_v60, %v100_v60  ;;  %v8094_v59 = vld [vmem:[%s10461_s1 + $0x490] sm:$0xff]  }
  0x32   :  { %7231 = vmatprep.subr.bf16.mxu1 %v8001_v1  ;;  %v8048_v1 = vld [vmem:[%s10461_s1 + $0x2b8] sm:$0xff]  }
  0x34   :  { %7210 = vmatpush3.bf16.msra.mxu0 %v8002_v2  ;;  %v441_v2 = vpack.c.bf16 %v102_v0, %v102_v0  ;;  %v8099_v0 = vld [vmem:[%s10461_s1 + $0x460] sm:$0xff]  }
  0x35   :  { %7232 = vmatpush3.bf16.msra.mxu1 %v8003_v3  ;;  %7211 = vmatprep.subr.bf16.mxu0 %v8004_v4  ;;  %v8050_v3 = vld [vmem:[%s10461_s1 + $0x340] sm:$0xff]  }
  0x36   :  { %7233 = vmatprep.subr.bf16.mxu1 %v8005_v5  ;;  %v8051_v4 = vld [vmem:[%s10461_s1 + $0x3c0] sm:$0xff]  }
  0x37   :  { %v8052_v5 = vld [vmem:[%s10461_s1 + $0x300] sm:$0xff]  }
  0x38   :  { %7212 = vmatpush3.bf16.msra.mxu0 %v8006_v6  ;;  %v438_v6 = vpack.c.bf16 %v93_v55, %v93_v55  ;;  %v8090_v55 = vld [vmem:[%s10461_s1 + $0x488] sm:$0xff]  }
  0x39   :  { %7234 = vmatpush3.bf16.msra.mxu1 %v8007_v7  ;;  %7213 = vmatprep.subr.bf16.mxu0 %v8008_v8  ;;  %v440_v7 = vpack.c.bf16 %v100_v60, %v100_v60  ;;  %v8053_v8 = vld [vmem:[%s10461_s1 + $0x380] sm:$0xff]   ;;  %v8095_v60 = vld [vmem:[%s10461_s1 + $0x458] sm:$0xff]  }
  0x3a   :  { %7235 = vmatprep.subr.bf16.mxu1 %v8009_v9  ;;  %v8054_v9 = vld [vmem:[%s10461_s1 + $0x348] sm:$0xff]  }
  0x3c   :  { %7214 = vmatpush3.bf16.msra.mxu0 %v8010_v11  ;;  %v8056_v11 = vld [vmem:[%s10461_s1 + $0x308] sm:$0xff]  }
  0x3d   :  { %7236 = vmatpush3.bf16.msra.mxu1 %v8011_v14  ;;  %7215 = vmatprep.subr.bf16.mxu0 %v8012_v15  ;;  %v8059_v14 = vld [vmem:[%s10461_s1 + $0x3d0] sm:$0xff]  }
  0x3e   :  { %7237 = vmatprep.subr.bf16.mxu1 %v8013_v18  ;;  %v8060_v15 = vld [vmem:[%s10461_s1 + $0x310] sm:$0xff]   ;;  %v8063_v18 = vld [vmem:[%s10461_s1 + $0x3d8] sm:$0xff]  }
  0x40   :  { %7216 = vmatpush3.bf16.msra.mxu0 %v8014_v19  ;;  %v8064_v19 = vld [vmem:[%s10461_s1 + $0x318] sm:$0xff]  }
  0x41   :  { %7238 = vmatpush3.bf16.msra.mxu1 %v8015_v22  ;;  %7245 = vmatprep.subr.bf16.mxu0 %v8017_v24  ;;  %v8067_v22 = vld [vmem:[%s10461_s1 + $0x3e0] sm:$0xff]  }
  0x42   :  { %7267 = vmatprep.subr.bf16.mxu1 %v8018_v25  ;;  %v8069_v24 = vld [vmem:[%s10461_s1 + $0x3a0] sm:$0xff]   ;;  %v8070_v25 = vld [vmem:[%s10461_s1 + $0x368] sm:$0xff]  }
  0x43   :  { %5230 = vmatmul.mubr.bf16.vlgmr.msra.gmra.mrb[4].mxu0 %v434_v27  ;;  %v8072_v27 = vld [vmem:[%s10461_s1 + $0x328] sm:$0xff]  }
  0x44   :  { %5270 = vmatmul.mubr.bf16.vlgmr.msra.gmra.mrb[4].mxu1 %v436_v28  ;;  %7246 = vmatpush3.bf16.msra.mxu0 %v8019_v26  ;;  %v8071_v26 = vld [vmem:[%s10461_s1 + $0x3e8] sm:$0xff]  }
  0x45   :  { %7268 = vmatpush3.bf16.msra.mxu1 %v8020_v29  ;;  %7247 = vmatprep.subr.bf16.mxu0 %v8021_v30  ;;  %v8073_v28 = vld [vmem:[%s10461_s1 + $0x3a8] sm:$0xff]   ;;  %v8074_v29 = vld [vmem:[%s10461_s1 + $0x370] sm:$0xff]  }
  0x46   :  { %7269 = vmatprep.subr.bf16.mxu1 %v8022_v31  ;;  %5309 = vmatprep.mubr.bf16.mxu0 %v439_v63  ;;  %v8075_v30 = vld [vmem:[%s10461_s1 + $0x3f0] sm:$0xff]   ;;  %v8098_v63 = vld [vmem:[%s10461_s1 + $0x498] sm:$0xff]  }
  0x47   :  { %5349 = vmatprep.mubr.bf16.mxu1 %v441_v2  ;;  %v8076_v31 = vld [vmem:[%s10461_s1 + $0x330] sm:$0xff]   ;;  %v8101_v2 = vld [vmem:[%s10461_s1 + $0x420] sm:$0xff]  }
  0x48   :  { %7248 = vmatpush3.bf16.msra.mxu0 %v8023_v32  ;;  %v19_v32 = vld [vmem:[%s10460_s0 + $0x18] sm:$0xff] }
  0x49   :  { %7270 = vmatpush3.bf16.msra.mxu1 %v8024_v33  ;;  %7249 = vmatprep.subr.bf16.mxu0 %v8025_v34  ;;  %v8077_v33 = vld [vmem:[%s10461_s1 + $0x3b0] sm:$0xff]   ;;  %v110_v34 = vrot.slane %v19_v32, %v8700_v41 }
  0x4a   :  { %7271 = vmatprep.subr.bf16.mxu1 %v8026_v35  ;;  %v103_v35 = vcombine.high %v19_v32, %v19_v32  ;;  %v8122_v32 = vld [vmem:[%s10461_s1 + $0x508] sm:$0xff]  }
  0x4c   :  { %7250 = vmatpush3.bf16.msra.mxu0 %v8027_v36  ;;  %v8078_v36 = vld [vmem:[%s10461_s1 + $0x378] sm:$0xff]  }
  0x4d   :  { %7272 = vmatpush3.bf16.msra.mxu1 %v8028_v37  ;;  %7251 = vmatprep.subr.bf16.mxu0 %v8029_v38  ;;  %v8079_v37 = vld [vmem:[%s10461_s1 + $0x3f8] sm:$0xff]   ;;  %v118_v38 = vcombine.high %v110_v34, %v110_v34 }
  0x4e   :  { %7273 = vmatprep.subr.bf16.mxu1 %v8030_v39  ;;  %v117_v39 = vrot.slane %v103_v35, %v8700_v41  ;;  %v8125_v35 = vld [vmem:[%s10461_s1 + $0x5d0] sm:$0xff]  }
  0x50   :  { %7252 = vmatpush3.bf16.msra.mxu0 %v8031_v40  ;;  %v8080_v40 = vld [vmem:[%s10461_s1 + $0x338] sm:$0xff]  }
  0x51   :  { %7274 = vmatpush3.bf16.msra.mxu1 %v8032_v42  ;;  %7253 = vmatprep.subr.bf16.mxu0 %v8033_v43  ;;  %v8081_v42 = vld [vmem:[%s10461_s1 + $0x3b8] sm:$0xff]   ;;  %v443_v43 = vpack.c.bf16 %v118_v38, %v118_v38 }
  0x52   :  { %7275 = vmatprep.subr.bf16.mxu1 %v8034_v44  ;;  %v119_v44 = vcombine.high %v117_v39, %v117_v39  ;;  %v8128_v38 = vld [vmem:[%s10461_s1 + $0x558] sm:$0xff]  }
  0x54   :  { %7254 = vmatpush3.bf16.msra.mxu0 %v8035_v45  ;;  %v8083_v45 = vld [vmem:[%s10461_s1 + $0x440] sm:$0xff]  }
  0x55   :  { %7276 = vmatpush3.bf16.msra.mxu1 %v8036_v46  ;;  %7255 = vmatprep.subr.bf16.mxu0 %v8037_v47  ;;  %v445_v46 = vpack.c.bf16 %v119_v44, %v119_v44  ;;  %v8084_v47 = vld [vmem:[%s10461_s1 + $0x4c0] sm:$0xff]  }
  0x56   :  { %7277 = vmatprep.subr.bf16.mxu1 %v8038_v48  ;;  %v8085_v48 = vld [vmem:[%s10461_s1 + $0x400] sm:$0xff]  }
  0x57   :  { %v8133_v44 = vld [vmem:[%s10461_s1 + $0x5e0] sm:$0xff]  }
  0x58   :  { %7256 = vmatpush3.bf16.msra.mxu0 %v8039_v49  ;;  %v442_v49 = vpack.c.bf16 %v110_v34, %v110_v34  ;;  %v8124_v34 = vld [vmem:[%s10461_s1 + $0x550] sm:$0xff]  }
  0x59   :  { %7278 = vmatpush3.bf16.msra.mxu1 %v8040_v50  ;;  %7257 = vmatprep.subr.bf16.mxu0 %v8041_v51  ;;  %v444_v50 = vpack.c.bf16 %v117_v39, %v117_v39  ;;  %v8086_v51 = vld [vmem:[%s10461_s1 + $0x480] sm:$0xff]   ;;  %v8129_v39 = vld [vmem:[%s10461_s1 + $0x5d8] sm:$0xff]  }
  0x5a   :  { %7279 = vmatprep.subr.bf16.mxu1 %v8042_v52  ;;  %v8087_v52 = vld [vmem:[%s10461_s1 + $0x448] sm:$0xff]  }
  0x5c   :  { %7258 = vmatpush3.bf16.msra.mxu0 %v8043_v54  ;;  %v8089_v54 = vld [vmem:[%s10461_s1 + $0x408] sm:$0xff]  }
  0x5d   :  { %7280 = vmatpush3.bf16.msra.mxu1 %v8044_v57  ;;  %7259 = vmatprep.subr.bf16.mxu0 %v8045_v58  ;;  %v8092_v57 = vld [vmem:[%s10461_s1 + $0x4d0] sm:$0xff]  }
  0x5e   :  { %7281 = vmatprep.subr.bf16.mxu1 %v8046_v61  ;;  %v8093_v58 = vld [vmem:[%s10461_s1 + $0x410] sm:$0xff]   ;;  %v8096_v61 = vld [vmem:[%s10461_s1 + $0x4d8] sm:$0xff]  }
  0x60   :  { %7260 = vmatpush3.bf16.msra.mxu0 %v8047_v62  ;;  %v8097_v62 = vld [vmem:[%s10461_s1 + $0x418] sm:$0xff]  }
  0x61   :  { %7282 = vmatpush3.bf16.msra.mxu1 %v8048_v1  ;;  %7289 = vmatprep.subr.bf16.mxu0 %v8050_v3  ;;  %v8100_v1 = vld [vmem:[%s10461_s1 + $0x4e0] sm:$0xff]  }
  0x62   :  { %7311 = vmatprep.subr.bf16.mxu1 %v8051_v4  ;;  %v8102_v3 = vld [vmem:[%s10461_s1 + $0x4a0] sm:$0xff]   ;;  %v8103_v4 = vld [vmem:[%s10461_s1 + $0x468] sm:$0xff]  }
  0x63   :  { %5310 = vmatmul.mubr.bf16.vlgmr.msra.gmra.mrb[8].mxu0 %v438_v6  ;;  %v8105_v6 = vld [vmem:[%s10461_s1 + $0x428] sm:$0xff]  }
  0x64   :  { %5350 = vmatmul.mubr.bf16.vlgmr.msra.gmra.mrb[8].mxu1 %v440_v7  ;;  %7290 = vmatpush3.bf16.msra.mxu0 %v8052_v5  ;;  %v8104_v5 = vld [vmem:[%s10461_s1 + $0x4e8] sm:$0xff]  }
  0x65   :  { %7312 = vmatpush3.bf16.msra.mxu1 %v8053_v8  ;;  %7291 = vmatprep.subr.bf16.mxu0 %v8054_v9  ;;  %v8106_v7 = vld [vmem:[%s10461_s1 + $0x4a8] sm:$0xff]   ;;  %v8107_v8 = vld [vmem:[%s10461_s1 + $0x470] sm:$0xff]  }
  0x66   :  { %7313 = vmatprep.subr.bf16.mxu1 %v8055_v10  ;;  %5389 = vmatprep.mubr.bf16.mxu0 %v443_v43  ;;  %v8108_v9 = vld [vmem:[%s10461_s1 + $0x4f0] sm:$0xff]   ;;  %v8132_v43 = vld [vmem:[%s10461_s1 + $0x560] sm:$0xff]  }
  0x67   :  { %5429 = vmatprep.mubr.bf16.mxu1 %v445_v46  ;;  %v8109_v10 = vld [vmem:[%s10461_s1 + $0x430] sm:$0xff]   ;;  %v8135_v46 = vld [vmem:[%s10461_s1 + $0x5a0] sm:$0xff]  }
  0x68   :  { %7292 = vmatpush3.bf16.msra.mxu0 %v8056_v11  ;;  %v20_v11 = vld [vmem:[%s10460_s0 + $0x20] sm:$0xff] }
  0x69   :  { %7314 = vmatpush3.bf16.msra.mxu1 %v8057_v12  ;;  %7293 = vmatprep.subr.bf16.mxu0 %v8058_v13  ;;  %v8110_v12 = vld [vmem:[%s10461_s1 + $0x4b0] sm:$0xff]   ;;  %v127_v13 = vrot.slane %v20_v11, %v8700_v41 }
  0x6a   :  { %7315 = vmatprep.subr.bf16.mxu1 %v8059_v14  ;;  %v120_v14 = vcombine.high %v20_v11, %v20_v11  ;;  %v8155_v11 = vld [vmem:[%s10461_s1 + $0x608] sm:$0xff]  }
  0x6c   :  { %7294 = vmatpush3.bf16.msra.mxu0 %v8060_v15  ;;  %v8111_v15 = vld [vmem:[%s10461_s1 + $0x478] sm:$0xff]  }
  0x6d   :  { %7316 = vmatpush3.bf16.msra.mxu1 %v8061_v16  ;;  %7295 = vmatprep.subr.bf16.mxu0 %v8062_v17  ;;  %v8112_v16 = vld [vmem:[%s10461_s1 + $0x4f8] sm:$0xff]   ;;  %v135_v17 = vcombine.high %v127_v13, %v127_v13 }
  0x6e   :  { %7317 = vmatprep.subr.bf16.mxu1 %v8063_v18  ;;  %v134_v18 = vrot.slane %v120_v14, %v8700_v41  ;;  %v8158_v14 = vld [vmem:[%s10461_s1 + $0x6d0] sm:$0xff]  }
  0x70   :  { %7296 = vmatpush3.bf16.msra.mxu0 %v8064_v19  ;;  %v8113_v19 = vld [vmem:[%s10461_s1 + $0x438] sm:$0xff]  }
  0x71   :  { %7318 = vmatpush3.bf16.msra.mxu1 %v8065_v20  ;;  %7297 = vmatprep.subr.bf16.mxu0 %v8066_v21  ;;  %v8114_v20 = vld [vmem:[%s10461_s1 + $0x4b8] sm:$0xff]   ;;  %v447_v21 = vpack.c.bf16 %v135_v17, %v135_v17 }
  0x72   :  { %7319 = vmatprep.subr.bf16.mxu1 %v8067_v22  ;;  %v136_v22 = vcombine.high %v134_v18, %v134_v18  ;;  %v8161_v17 = vld [vmem:[%s10461_s1 + $0x658] sm:$0xff]  }
  0x74   :  { %7298 = vmatpush3.bf16.msra.mxu0 %v8068_v23  ;;  %v8116_v23 = vld [vmem:[%s10461_s1 + $0x540] sm:$0xff]  }
  0x75   :  { %7320 = vmatpush3.bf16.msra.mxu1 %v8069_v24  ;;  %7299 = vmatprep.subr.bf16.mxu0 %v8070_v25  ;;  %v449_v24 = vpack.c.bf16 %v136_v22, %v136_v22  ;;  %v8117_v25 = vld [vmem:[%s10461_s1 + $0x5c0] sm:$0xff]  }
  0x76   :  { %7321 = vmatprep.subr.bf16.mxu1 %v8071_v26  ;;  %v8118_v26 = vld [vmem:[%s10461_s1 + $0x500] sm:$0xff]  }
  0x77   :  { %v8166_v22 = vld [vmem:[%s10461_s1 + $0x6e0] sm:$0xff]  }
  0x78   :  { %7300 = vmatpush3.bf16.msra.mxu0 %v8072_v27  ;;  %v446_v27 = vpack.c.bf16 %v127_v13, %v127_v13  ;;  %v8157_v13 = vld [vmem:[%s10461_s1 + $0x650] sm:$0xff]  }
  0x79   :  { %7322 = vmatpush3.bf16.msra.mxu1 %v8073_v28  ;;  %7301 = vmatprep.subr.bf16.mxu0 %v8074_v29  ;;  %v448_v28 = vpack.c.bf16 %v134_v18, %v134_v18  ;;  %v8119_v29 = vld [vmem:[%s10461_s1 + $0x580] sm:$0xff]   ;;  %v8162_v18 = vld [vmem:[%s10461_s1 + $0x6d8] sm:$0xff]  }
  0x7a   :  { %7323 = vmatprep.subr.bf16.mxu1 %v8075_v30  ;;  %v8120_v30 = vld [vmem:[%s10461_s1 + $0x548] sm:$0xff]  }
  0x7c   :  { %7302 = vmatpush3.bf16.msra.mxu0 %v8076_v31  ;;  %v8121_v31 = vld [vmem:[%s10461_s1 + $0x5c8] sm:$0xff]  }
  0x7d   :  { %7324 = vmatpush3.bf16.msra.mxu1 %v8077_v33  ;;  %7303 = vmatprep.subr.bf16.mxu0 %v8078_v36  ;;  %v8123_v33 = vld [vmem:[%s10461_s1 + $0x588] sm:$0xff]   ;;  %v8126_v36 = vld [vmem:[%s10461_s1 + $0x510] sm:$0xff]  }
  0x7e   :  { %7325 = vmatprep.subr.bf16.mxu1 %v8079_v37  ;;  %v8127_v37 = vld [vmem:[%s10461_s1 + $0x590] sm:$0xff]  }
  0x80   :  { %7304 = vmatpush3.bf16.msra.mxu0 %v8080_v40  ;;  %v8130_v40 = vld [vmem:[%s10461_s1 + $0x518] sm:$0xff]  }
  0x81   :  { %7326 = vmatpush3.bf16.msra.mxu1 %v8081_v42  ;;  %7333 = vmatprep.subr.bf16.mxu0 %v8083_v45  ;;  %v8131_v42 = vld [vmem:[%s10461_s1 + $0x598] sm:$0xff]   ;;  %v8134_v45 = vld [vmem:[%s10461_s1 + $0x520] sm:$0xff]  }
  0x82   :  { %7355 = vmatprep.subr.bf16.mxu1 %v8084_v47  ;;  %v8136_v47 = vld [vmem:[%s10461_s1 + $0x568] sm:$0xff]  }
  0x83   :  { %5390 = vmatmul.mubr.bf16.vlgmr.msra.gmra.mrb[12].mxu0 %v442_v49  ;;  %v8138_v49 = vld [vmem:[%s10461_s1 + $0x528] sm:$0xff]  }
  0x84   :  { %5430 = vmatmul.mubr.bf16.vlgmr.msra.gmra.mrb[12].mxu1 %v444_v50  ;;  %7334 = vmatpush3.bf16.msra.mxu0 %v8085_v48  ;;  %v8137_v48 = vld [vmem:[%s10461_s1 + $0x5e8] sm:$0xff]  }
  0x85   :  { %7356 = vmatpush3.bf16.msra.mxu1 %v8086_v51  ;;  %7335 = vmatprep.subr.bf16.mxu0 %v8087_v52  ;;  %v8139_v50 = vld [vmem:[%s10461_s1 + $0x5a8] sm:$0xff]   ;;  %v8140_v51 = vld [vmem:[%s10461_s1 + $0x570] sm:$0xff]  }
  0x86   :  { %7357 = vmatprep.subr.bf16.mxu1 %v8088_v53  ;;  %5469 = vmatprep.mubr.bf16.mxu0 %v447_v21  ;;  %v8141_v52 = vld [vmem:[%s10461_s1 + $0x5f0] sm:$0xff]   ;;  %v8165_v21 = vld [vmem:[%s10461_s1 + $0x660] sm:$0xff]  }
  0x87   :  { %5509 = vmatprep.mubr.bf16.mxu1 %v449_v24  ;;  %v8142_v53 = vld [vmem:[%s10461_s1 + $0x530] sm:$0xff]   ;;  %v8168_v24 = vld [vmem:[%s10461_s1 + $0x6a0] sm:$0xff]  }
  0x88   :  { %7336 = vmatpush3.bf16.msra.mxu0 %v8089_v54  ;;  %v21_v54 = vld [vmem:[%s10460_s0 + $0x28] sm:$0xff] }
  0x89   :  { %7358 = vmatpush3.bf16.msra.mxu1 %v8090_v55  ;;  %7337 = vmatprep.subr.bf16.mxu0 %v8091_v56  ;;  %v8143_v55 = vld [vmem:[%s10461_s1 + $0x5b0] sm:$0xff]   ;;  %v144_v56 = vrot.slane %v21_v54, %v8700_v41 }
  0x8a   :  { %7359 = vmatprep.subr.bf16.mxu1 %v8092_v57  ;;  %v137_v57 = vcombine.high %v21_v54, %v21_v54  ;;  %v8188_v54 = vld [vmem:[%s10461_s1 + $0x708] sm:$0xff]  }
  0x8c   :  { %7338 = vmatpush3.bf16.msra.mxu0 %v8093_v58  ;;  %v8144_v58 = vld [vmem:[%s10461_s1 + $0x578] sm:$0xff]  }
  0x8d   :  { %7360 = vmatpush3.bf16.msra.mxu1 %v8094_v59  ;;  %7339 = vmatprep.subr.bf16.mxu0 %v8095_v60  ;;  %v8145_v59 = vld [vmem:[%s10461_s1 + $0x5f8] sm:$0xff]   ;;  %v152_v60 = vcombine.high %v144_v56, %v144_v56 }
  0x8e   :  { %7361 = vmatprep.subr.bf16.mxu1 %v8096_v61  ;;  %v151_v61 = vrot.slane %v137_v57, %v8700_v41  ;;  %v8191_v57 = vld [vmem:[%s10461_s1 + $0x7d0] sm:$0xff]  }
  0x90   :  { %7340 = vmatpush3.bf16.msra.mxu0 %v8097_v62  ;;  %v8146_v62 = vld [vmem:[%s10461_s1 + $0x538] sm:$0xff]  }
  0x91   :  { %7362 = vmatpush3.bf16.msra.mxu1 %v8098_v63  ;;  %7341 = vmatprep.subr.bf16.mxu0 %v8099_v0  ;;  %v8147_v63 = vld [vmem:[%s10461_s1 + $0x5b8] sm:$0xff]   ;;  %v451_v0 = vpack.c.bf16 %v152_v60, %v152_v60 }
  0x92   :  { %7363 = vmatprep.subr.bf16.mxu1 %v8100_v1  ;;  %v153_v1 = vcombine.high %v151_v61, %v151_v61  ;;  %v8194_v60 = vld [vmem:[%s10461_s1 + $0x758] sm:$0xff]  }
  0x94   :  { %7342 = vmatpush3.bf16.msra.mxu0 %v8101_v2  ;;  %v8149_v2 = vld [vmem:[%s10461_s1 + $0x640] sm:$0xff]  }
  0x95   :  { %7364 = vmatpush3.bf16.msra.mxu1 %v8102_v3  ;;  %7343 = vmatprep.subr.bf16.mxu0 %v8103_v4  ;;  %v453_v3 = vpack.c.bf16 %v153_v1, %v153_v1  ;;  %v8150_v4 = vld [vmem:[%s10461_s1 + $0x6c0] sm:$0xff]  }
  0x96   :  { %7365 = vmatprep.subr.bf16.mxu1 %v8104_v5  ;;  %v8151_v5 = vld [vmem:[%s10461_s1 + $0x600] sm:$0xff]  }
  0x97   :  { %v8199_v1 = vld [vmem:[%s10461_s1 + $0x7e0] sm:$0xff]  }
  0x98   :  { %7344 = vmatpush3.bf16.msra.mxu0 %v8105_v6  ;;  %v450_v6 = vpack.c.bf16 %v144_v56, %v144_v56  ;;  %v8190_v56 = vld [vmem:[%s10461_s1 + $0x750] sm:$0xff]  }
  0x99   :  { %7366 = vmatpush3.bf16.msra.mxu1 %v8106_v7  ;;  %7345 = vmatprep.subr.bf16.mxu0 %v8107_v8  ;;  %v452_v7 = vpack.c.bf16 %v151_v61, %v151_v61  ;;  %v8152_v8 = vld [vmem:[%s10461_s1 + $0x680] sm:$0xff]   ;;  %v8195_v61 = vld [vmem:[%s10461_s1 + $0x7d8] sm:$0xff]  }
  0x9a   :  { %7367 = vmatprep.subr.bf16.mxu1 %v8108_v9  ;;  %v8153_v9 = vld [vmem:[%s10461_s1 + $0x648] sm:$0xff]  }
  0x9c   :  { %7346 = vmatpush3.bf16.msra.mxu0 %v8109_v10  ;;  %v8154_v10 = vld [vmem:[%s10461_s1 + $0x6c8] sm:$0xff]  }
  0x9d   :  { %7368 = vmatpush3.bf16.msra.mxu1 %v8110_v12  ;;  %7347 = vmatprep.subr.bf16.mxu0 %v8111_v15  ;;  %v8156_v12 = vld [vmem:[%s10461_s1 + $0x688] sm:$0xff]   ;;  %v8159_v15 = vld [vmem:[%s10461_s1 + $0x610] sm:$0xff]  }
  0x9e   :  { %7369 = vmatprep.subr.bf16.mxu1 %v8112_v16  ;;  %v8160_v16 = vld [vmem:[%s10461_s1 + $0x690] sm:$0xff]  }
  0xa0   :  { %7348 = vmatpush3.bf16.msra.mxu0 %v8113_v19  ;;  %v8163_v19 = vld [vmem:[%s10461_s1 + $0x618] sm:$0xff]  }
  0xa1   :  { %7370 = vmatpush3.bf16.msra.mxu1 %v8114_v20  ;;  %7377 = vmatprep.subr.bf16.mxu0 %v8116_v23  ;;  %v8164_v20 = vld [vmem:[%s10461_s1 + $0x698] sm:$0xff]   ;;  %v8167_v23 = vld [vmem:[%s10461_s1 + $0x620] sm:$0xff]  }
  0xa2   :  { %7399 = vmatprep.subr.bf16.mxu1 %v8117_v25  ;;  %v8169_v25 = vld [vmem:[%s10461_s1 + $0x668] sm:$0xff]  }
  0xa3   :  { %5470 = vmatmul.mubr.bf16.vlgmr.msra.gmra.mrb[16].mxu0 %v446_v27  ;;  %v8171_v27 = vld [vmem:[%s10461_s1 + $0x628] sm:$0xff]  }
  0xa4   :  { %5510 = vmatmul.mubr.bf16.vlgmr.msra.gmra.mrb[16].mxu1 %v448_v28  ;;  %7378 = vmatpush3.bf16.msra.mxu0 %v8118_v26  ;;  %v8170_v26 = vld [vmem:[%s10461_s1 + $0x6e8] sm:$0xff]  }
  0xa5   :  { %7400 = vmatpush3.bf16.msra.mxu1 %v8119_v29  ;;  %7379 = vmatprep.subr.bf16.mxu0 %v8120_v30  ;;  %v8172_v28 = vld [vmem:[%s10461_s1 + $0x6a8] sm:$0xff]   ;;  %v8173_v29 = vld [vmem:[%s10461_s1 + $0x670] sm:$0xff]  }
  0xa6   :  { %7401 = vmatprep.subr.bf16.mxu1 %v8121_v31  ;;  %5549 = vmatprep.mubr.bf16.mxu0 %v451_v0  ;;  %v8174_v30 = vld [vmem:[%s10461_s1 + $0x6f0] sm:$0xff]   ;;  %v8198_v0 = vld [vmem:[%s10461_s1 + $0x760] sm:$0xff]  }
  0xa7   :  { %5589 = vmatprep.mubr.bf16.mxu1 %v453_v3  ;;  %v8175_v31 = vld [vmem:[%s10461_s1 + $0x630] sm:$0xff]   ;;  %v8201_v3 = vld [vmem:[%s10461_s1 + $0x7a0] sm:$0xff]  }
  0xa8   :  { %7380 = vmatpush3.bf16.msra.mxu0 %v8122_v32  ;;  %v8176_v32 = vld [vmem:[%s10461_s1 + $0x6b0] sm:$0xff]  }
  0xa9   :  { %7402 = vmatpush3.bf16.msra.mxu1 %v8123_v33  ;;  %7381 = vmatprep.subr.bf16.mxu0 %v8124_v34  ;;  %v22_v33 = vld [vmem:[%s10460_s0 + $0x30] sm:$0xff]  ;;  %v8177_v34 = vld [vmem:[%s10461_s1 + $0x678] sm:$0xff]  }
  0xaa   :  { %7403 = vmatprep.subr.bf16.mxu1 %v8125_v35  ;;  %v161_v35 = vrot.slane %v22_v33, %v8700_v41 }
  0xac   :  { %7382 = vmatpush3.bf16.msra.mxu0 %v8126_v36  ;;  %v154_v36 = vcombine.high %v22_v33, %v22_v33 }
  0xad   :  { %7404 = vmatpush3.bf16.msra.mxu1 %v8127_v37  ;;  %7383 = vmatprep.subr.bf16.mxu0 %v8128_v38  ;;  %v8178_v37 = vld [vmem:[%s10461_s1 + $0x6f8] sm:$0xff]  }
  0xae   :  { %7405 = vmatprep.subr.bf16.mxu1 %v8129_v39  ;;  %v8179_v38 = vld [vmem:[%s10461_s1 + $0x638] sm:$0xff]   ;;  %v169_v39 = vcombine.high %v161_v35, %v161_v35 }
  0xb0   :  { %7384 = vmatpush3.bf16.msra.mxu0 %v8130_v40  ;;  %v168_v40 = vrot.slane %v154_v36, %v8700_v41 }
  0xb1   :  { %7406 = vmatpush3.bf16.msra.mxu1 %v8131_v42  ;;  %7385 = vmatprep.subr.bf16.mxu0 %v8132_v43  ;;  %v8180_v42 = vld [vmem:[%s10461_s1 + $0x6b8] sm:$0xff]   ;;  %v455_v43 = vpack.c.bf16 %v169_v39, %v169_v39 }
  0xb2   :  { %7407 = vmatprep.subr.bf16.mxu1 %v8133_v44  ;;  %v170_v44 = vcombine.high %v168_v40, %v168_v40 }
  0xb4   :  { %7386 = vmatpush3.bf16.msra.mxu0 %v8134_v45  ;;  %v8182_v45 = vld [vmem:[%s10461_s1 + $0x740] sm:$0xff]  }
  0xb5   :  { %7408 = vmatpush3.bf16.msra.mxu1 %v8135_v46  ;;  %7387 = vmatprep.subr.bf16.mxu0 %v8136_v47  ;;  %v8183_v46 = vld [vmem:[%s10461_s1 + $0x7c0] sm:$0xff]   ;;  %v457_v47 = vpack.c.bf16 %v170_v44, %v170_v44  ;;  %v8219_v44 = vld [vmem:[%s10461_s1 + $0x848] sm:$0xff]  }
  0xb6   :  { %7409 = vmatprep.subr.bf16.mxu1 %v8137_v48  ;;  %v8184_v48 = vld [vmem:[%s10461_s1 + $0x700] sm:$0xff]  }
  0xb8   :  { %7388 = vmatpush3.bf16.msra.mxu0 %v8138_v49  ;;  %v454_v49 = vpack.c.bf16 %v161_v35, %v161_v35 }
  0xb9   :  { %7410 = vmatpush3.bf16.msra.mxu1 %v8139_v50  ;;  %7389 = vmatprep.subr.bf16.mxu0 %v8140_v51  ;;  %v456_v50 = vpack.c.bf16 %v168_v40, %v168_v40  ;;  %v8185_v51 = vld [vmem:[%s10461_s1 + $0x780] sm:$0xff]  }
  0xba   :  { %7411 = vmatprep.subr.bf16.mxu1 %v8141_v52  ;;  %v8186_v52 = vld [vmem:[%s10461_s1 + $0x748] sm:$0xff]  }
  0xbc   :  { %7390 = vmatpush3.bf16.msra.mxu0 %v8142_v53  ;;  %v8187_v53 = vld [vmem:[%s10461_s1 + $0x7c8] sm:$0xff]  }
  0xbd   :  { %7412 = vmatpush3.bf16.msra.mxu1 %v8143_v55  ;;  %7391 = vmatprep.subr.bf16.mxu0 %v8144_v58  ;;  %v8189_v55 = vld [vmem:[%s10461_s1 + $0x788] sm:$0xff]   ;;  %v8192_v58 = vld [vmem:[%s10461_s1 + $0x710] sm:$0xff]  }
  0xbe   :  { %7413 = vmatprep.subr.bf16.mxu1 %v8145_v59  ;;  %v8193_v59 = vld [vmem:[%s10461_s1 + $0x790] sm:$0xff]  }
  0xc0   :  { %7392 = vmatpush3.bf16.msra.mxu0 %v8146_v62  ;;  %v8196_v62 = vld [vmem:[%s10461_s1 + $0x718] sm:$0xff]  }
  0xc1   :  { %7414 = vmatpush3.bf16.msra.mxu1 %v8147_v63  ;;  %7421 = vmatprep.subr.bf16.mxu0 %v8149_v2  ;;  %v8197_v63 = vld [vmem:[%s10461_s1 + $0x798] sm:$0xff]   ;;  %v8200_v2 = vld [vmem:[%s10461_s1 + $0x720] sm:$0xff]  }
  0xc2   :  { %7443 = vmatprep.subr.bf16.mxu1 %v8150_v4  ;;  %v8202_v4 = vld [vmem:[%s10461_s1 + $0x768] sm:$0xff]  }
  0xc3   :  { %5550 = vmatmul.mubr.bf16.vlgmr.msra.gmra.mrb[20].mxu0 %v450_v6  ;;  %v8204_v6 = vld [vmem:[%s10461_s1 + $0x728] sm:$0xff]  }
  0xc4   :  { %5590 = vmatmul.mubr.bf16.vlgmr.msra.gmra.mrb[20].mxu1 %v452_v7  ;;  %7422 = vmatpush3.bf16.msra.mxu0 %v8151_v5  ;;  %v8203_v5 = vld [vmem:[%s10461_s1 + $0x7e8] sm:$0xff]  }
  0xc5   :  { %7444 = vmatpush3.bf16.msra.mxu1 %v8152_v8  ;;  %7423 = vmatprep.subr.bf16.mxu0 %v8153_v9  ;;  %v8205_v7 = vld [vmem:[%s10461_s1 + $0x7a8] sm:$0xff]   ;;  %v8206_v8 = vld [vmem:[%s10461_s1 + $0x770] sm:$0xff]   ;;  %v6579_v9 = vld [vmem:[%s10462_s2] ss:$0 sm:$0xff] }
  0xc6   :  { %7445 = vmatprep.subr.bf16.mxu1 %v8154_v10  ;;  %5629 = vmatprep.mubr.bf16.mxu0 %v455_v43  ;;  %v8207_v10 = vld [vmem:[%s10461_s1 + $0x7f0] sm:$0xff]   ;;  %v8218_v43 = vld [vmem:[%s10461_s1 + $0x880] sm:$0xff]  }
  0xc7   :  { %5669 = vmatprep.mubr.bf16.mxu1 %v457_v47  ;;  %v8222_v47 = vld [vmem:[%s10461_s1 + $0x888] sm:$0xff]  }
  0xc8   :  { %7424 = vmatpush3.bf16.msra.mxu0 %v8155_v11 }
  0xc9   :  { %7446 = vmatpush3.bf16.msra.mxu1 %v8156_v12  ;;  %7425 = vmatprep.subr.bf16.mxu0 %v8157_v13  ;;  %v8208_v13 = vld [vmem:[%s10461_s1 + $0x730] sm:$0xff]  }
  0xca   :  { %7447 = vmatprep.subr.bf16.mxu1 %v8158_v14  ;;  %v8209_v14 = vld [vmem:[%s10461_s1 + $0x7b0] sm:$0xff]  }
  0xcc   :  { %7426 = vmatpush3.bf16.msra.mxu0 %v8159_v15 }
  0xcd   :  { %7448 = vmatpush3.bf16.msra.mxu1 %v8160_v16  ;;  %7427 = vmatprep.subr.bf16.mxu0 %v8161_v17  ;;  %v8210_v17 = vld [vmem:[%s10461_s1 + $0x778] sm:$0xff]  }
  0xce   :  { %7449 = vmatprep.subr.bf16.mxu1 %v8162_v18 }
  0xd0   :  { %7428 = vmatpush3.bf16.msra.mxu0 %v8163_v19 }
  0xd1   :  { %7450 = vmatpush3.bf16.msra.mxu1 %v8164_v20  ;;  %7429 = vmatprep.subr.bf16.mxu0 %v8165_v21 }
  0xd2   :  { %7451 = vmatprep.subr.bf16.mxu1 %v8166_v22  ;;  %v8211_v22 = vld [vmem:[%s10461_s1 + $0x7f8] sm:$0xff]  }
  0xd4   :  { %7430 = vmatpush3.bf16.msra.mxu0 %v8167_v23  ;;  %v23_v23 = vld [vmem:[%s10460_s0 + $0x38] sm:$0xff] }
  0xd5   :  { %7452 = vmatpush3.bf16.msra.mxu1 %v8168_v24  ;;  %7431 = vmatprep.subr.bf16.mxu0 %v8169_v25 }
  0xd6   :  { %7453 = vmatprep.subr.bf16.mxu1 %v8170_v26  ;;  %v178_v26 = vrot.slane %v23_v23, %v8700_v41 }
  0xd8   :  { %7432 = vmatpush3.bf16.msra.mxu0 %v8171_v27  ;;  %v171_v27 = vcombine.high %v23_v23, %v23_v23  ;;  %v458_v40 = vpack.c.bf16 %v178_v26, %v178_v26 }
  0xd9   :  { %7454 = vmatpush3.bf16.msra.mxu1 %v8172_v28  ;;  %7433 = vmatprep.subr.bf16.mxu0 %v8173_v29  ;;  %v8212_v29 = vld [vmem:[%s10461_s1 + $0x738] sm:$0xff]  }
  0xda   :  { %7455 = vmatprep.subr.bf16.mxu1 %v8174_v30  ;;  %v8213_v30 = vld [vmem:[%s10461_s1 + $0x7b8] sm:$0xff]  }
  0xdc   :  { %7434 = vmatpush3.bf16.msra.mxu0 %v8175_v31  ;;  %v186_v31 = vcombine.high %v178_v26, %v178_v26  ;;  %v8249_v26 = vld [vmem:[%s10461_s1 + $0x9c0] sm:$0xff]  }
  0xdd   :  { %7456 = vmatpush3.bf16.msra.mxu1 %v8176_v32  ;;  %7435 = vmatprep.subr.bf16.mxu0 %v8177_v34  ;;  %v185_v32 = vrot.slane %v171_v27, %v8700_v41  ;;  %v8215_v34 = vld [vmem:[%s10461_s1 + $0x840] sm:$0xff]  }
  0xde   :  { %7457 = vmatprep.subr.bf16.mxu1 %v8178_v37  ;;  %v459_v35 = vpack.c.bf16 %v186_v31, %v186_v31  ;;  %v8216_v37 = vld [vmem:[%s10461_s1 + $0x8c0] sm:$0xff]  }
  0xdf   :  { %v187_v36 = vcombine.high %v185_v32, %v185_v32 }
  0xe0   :  { %7436 = vmatpush3.bf16.msra.mxu0 %v8179_v38  ;;  %v8217_v38 = vld [vmem:[%s10461_s1 + $0x800] sm:$0xff]  }
  0xe1   :  { %7458 = vmatpush3.bf16.msra.mxu1 %v8180_v42  ;;  %7465 = vmatprep.subr.bf16.mxu0 %v8182_v45  ;;  %v461_v39 = vpack.c.bf16 %v187_v36, %v187_v36  ;;  %v460_v42 = vpack.c.bf16 %v185_v32, %v185_v32  ;;  %v8220_v45 = vld [vmem:[%s10461_s1 + $0x8c8] sm:$0xff]   ;;  %v8251_v32 = vld [vmem:[%s10461_s1 + $0x980] sm:$0xff]  }
  0xe2   :  { %7487 = vmatprep.subr.bf16.mxu1 %v8183_v46  ;;  %v8221_v46 = vld [vmem:[%s10461_s1 + $0x808] sm:$0xff]  }
  0xe3   :  { %5630 = vmatmul.mubr.bf16.vlgmr.msra.gmra.mrb[24].mxu0 %v454_v49  ;;  %v8224_v49 = vld [vmem:[%s10461_s1 + $0x8d0] sm:$0xff]   ;;  %v8254_v36 = vld [vmem:[%s10461_s1 + $0x908] sm:$0xff]  }
  0xe4   :  { %5670 = vmatmul.mubr.bf16.vlgmr.msra.gmra.mrb[24].mxu1 %v456_v50  ;;  %7466 = vmatpush3.bf16.msra.mxu0 %v8184_v48  ;;  %v8223_v48 = vld [vmem:[%s10461_s1 + $0x850] sm:$0xff]  }
  0xe5   :  { %7488 = vmatpush3.bf16.msra.mxu1 %v8185_v51  ;;  %7467 = vmatprep.subr.bf16.mxu0 %v8186_v52  ;;  %v8225_v50 = vld [vmem:[%s10461_s1 + $0x810] sm:$0xff]   ;;  %v8227_v52 = vld [vmem:[%s10461_s1 + $0x858] sm:$0xff]  }
  0xe6   :  { %7489 = vmatprep.subr.bf16.mxu1 %v8187_v53  ;;  %5709 = vmatprep.mubr.bf16.mxu0 %v459_v35  ;;  %v8226_v51 = vld [vmem:[%s10461_s1 + $0x890] sm:$0xff]   ;;  %v8228_v53 = vld [vmem:[%s10461_s1 + $0x8d8] sm:$0xff]   ;;  %v8253_v35 = vld [vmem:[%s10461_s1 + $0x9c8] sm:$0xff]  }
  0xe7   :  { %5749 = vmatprep.mubr.bf16.mxu1 %v461_v39  ;;  %v8257_v39 = vld [vmem:[%s10461_s1 + $0x9d0] sm:$0xff]  }
  0xe8   :  { %7468 = vmatpush3.bf16.msra.mxu0 %v8188_v54  ;;  %v8229_v54 = vld [vmem:[%s10461_s1 + $0x818] sm:$0xff]  }
  0xe9   :  { %7490 = vmatpush3.bf16.msra.mxu1 %v8189_v55  ;;  %7469 = vmatprep.subr.bf16.mxu0 %v8190_v56  ;;  %v8230_v55 = vld [vmem:[%s10461_s1 + $0x898] sm:$0xff]   ;;  %v8231_v56 = vld [vmem:[%s10461_s1 + $0x860] sm:$0xff]  }
  0xea   :  { %7491 = vmatprep.subr.bf16.mxu1 %v8191_v57  ;;  %v8232_v57 = vld [vmem:[%s10461_s1 + $0x8e0] sm:$0xff]  }
  0xec   :  { %7470 = vmatpush3.bf16.msra.mxu0 %v8192_v58  ;;  %v8233_v58 = vld [vmem:[%s10461_s1 + $0x820] sm:$0xff]  }
  0xed   :  { %7492 = vmatpush3.bf16.msra.mxu1 %v8193_v59  ;;  %7471 = vmatprep.subr.bf16.mxu0 %v8194_v60  ;;  %v8234_v59 = vld [vmem:[%s10461_s1 + $0x8a0] sm:$0xff]   ;;  %v8235_v60 = vld [vmem:[%s10461_s1 + $0x868] sm:$0xff]  }
  0xee   :  { %7493 = vmatprep.subr.bf16.mxu1 %v8195_v61  ;;  %v8236_v61 = vld [vmem:[%s10461_s1 + $0x8e8] sm:$0xff]  }
  0xf0   :  { %7472 = vmatpush3.bf16.msra.mxu0 %v8196_v62  ;;  %v8237_v62 = vld [vmem:[%s10461_s1 + $0x828] sm:$0xff]  }
  0xf1   :  { %7494 = vmatpush3.bf16.msra.mxu1 %v8197_v63  ;;  %7473 = vmatprep.subr.bf16.mxu0 %v8198_v0  ;;  %v8238_v63 = vld [vmem:[%s10461_s1 + $0x8a8] sm:$0xff]   ;;  %v8239_v0 = vld [vmem:[%s10461_s1 + $0x870] sm:$0xff]  }
  0xf2   :  { %7495 = vmatprep.subr.bf16.mxu1 %v8199_v1  ;;  %v8240_v1 = vld [vmem:[%s10461_s1 + $0x8f0] sm:$0xff]  }
  0xf4   :  { %7474 = vmatpush3.bf16.msra.mxu0 %v8200_v2 }
  0xf5   :  { %7496 = vmatpush3.bf16.msra.mxu1 %v8201_v3  ;;  %7475 = vmatprep.subr.bf16.mxu0 %v8202_v4  ;;  %v8241_v4 = vld [vmem:[%s10461_s1 + $0x830] sm:$0xff]  }
  0xf6   :  { %7497 = vmatprep.subr.bf16.mxu1 %v8203_v5  ;;  %v7173_v11 = vpop.f32.mrb[0].mxu0  ;;  %v8242_v5 = vld [vmem:[%s10461_s1 + $0x8b0] sm:$0xff]  }
  0xf7   :  { %v7195_v12 = vpop.f32.mrb[0].mxu1  ;;  %v7174_v15 = vpop.f32.mrb[1].mxu0 }
  0xf8   :  { %v7196_v16 = vpop.f32.mrb[1].mxu1  ;;  %v7175_v18 = vadd.f32 %v7174_v15, %v7173_v11  ;;  %v7176_v20 = vpop.f32.mrb[2].mxu0  ;;  %7476 = vmatpush3.bf16.msra.mxu0 %v8204_v6  ;;  %v8244_v15 = vld [vmem:[%s10461_s1 + $0x8f8] sm:$0xff]  }
  0xf9   :  { %v7197_v19 = vadd.f32 %v7196_v16, %v7195_v12  ;;  %v7198_v21 = vpop.f32.mrb[2].mxu1  ;;  %7498 = vmatpush3.bf16.msra.mxu1 %v8205_v7  ;;  %v7177_v24 = vpop.f32.mrb[3].mxu0  ;;  %7477 = vmatprep.subr.bf16.mxu0 %v8206_v8  ;;  %v8243_v8 = vld [vmem:[%s10461_s1 + $0x878] sm:$0xff]   ;;  %v24_v16 = vld [vmem:[%s10460_s0 + $0x40] sm:$0xff] }
  0xfa   :  { %v7199_v25 = vpop.f32.mrb[3].mxu1  ;;  %7499 = vmatprep.subr.bf16.mxu1 %v8207_v10  ;;  %v5152_v28 = vadd.f32 %v7175_v18, %v6579_v9  ;;  %v8245_v18 = vld [vmem:[%s10461_s1 + $0x838] sm:$0xff]   ;;  %v188_v20 = vcombine.high %v24_v16, %v24_v16 }
  0xfb   :  { %v8246_v21 = vld [vmem:[%s10461_s1 + $0x8b8] sm:$0xff]   ;;  %v8248_v25 = vld [vmem:[%s10461_s1 + $0x940] sm:$0xff]  }
  0xfc   :  { %v9408_v33 = vadd.f32 %v7197_v19, %v5152_v28  ;;  %7478 = vmatpush3.bf16.msra.mxu0 %v8208_v13  ;;  %v195_v19 = vrot.slane %v24_v16, %v8700_v41  ;;  %v202_v24 = vrot.slane %v188_v20, %v8700_v41  ;;  %v8281_v16 = vld [vmem:[%s10461_s1 + $0xa40] sm:$0xff]  }
  0xfd   :  { %7500 = vmatpush3.bf16.msra.mxu1 %v8209_v14  ;;  %7479 = vmatprep.subr.bf16.mxu0 %v8210_v17 }
  0xfe   :  { %7501 = vmatprep.subr.bf16.mxu1 %v8211_v22  ;;  %v203_v23 = vcombine.high %v195_v19, %v195_v19  ;;  %v204_v28 = vcombine.high %v202_v24, %v202_v24  ;;  %v464_v31 = vpack.c.bf16 %v202_v24, %v202_v24 }
 0x100   :  { %7480 = vmatpush3.bf16.msra.mxu0 %v8212_v29  ;;  %v463_v27 = vpack.c.bf16 %v203_v23, %v203_v23  ;;  %v8250_v29 = vld [vmem:[%s10461_s1 + $0x900] sm:$0xff]  }
 0x101   :  { %7502 = vmatpush3.bf16.msra.mxu1 %v8213_v30  ;;  %7509 = vmatprep.subr.bf16.mxu0 %v8215_v34  ;;  %v462_v30 = vpack.c.bf16 %v195_v19, %v195_v19  ;;  %v8252_v34 = vld [vmem:[%s10461_s1 + $0x948] sm:$0xff]   ;;  %v8284_v23 = vld [vmem:[%s10461_s1 + $0xa80] sm:$0xff]  }
 0x102   :  { %7531 = vmatprep.subr.bf16.mxu1 %v8216_v37  ;;  %v8255_v37 = vld [vmem:[%s10461_s1 + $0x988] sm:$0xff]  }
 0x103   :  { %5710 = vmatmul.mubr.bf16.vlgmr.msra.gmra.mrb[28].mxu0 %v458_v40  ;;  %v8258_v40 = vld [vmem:[%s10461_s1 + $0x910] sm:$0xff]  }
 0x104   :  { %5750 = vmatmul.mubr.bf16.vlgmr.msra.gmra.mrb[28].mxu1 %v460_v42  ;;  %7510 = vmatpush3.bf16.msra.mxu0 %v8217_v38  ;;  %v8256_v38 = vld [vmem:[%s10461_s1 + $0x950] sm:$0xff]  }
 0x105   :  { %7532 = vmatpush3.bf16.msra.mxu1 %v8218_v43  ;;  %7511 = vmatprep.subr.bf16.mxu0 %v8219_v44  ;;  %v8259_v42 = vld [vmem:[%s10461_s1 + $0x990] sm:$0xff]   ;;  %v8260_v43 = vld [vmem:[%s10461_s1 + $0x958] sm:$0xff]  }
 0x106   :  { %7533 = vmatprep.subr.bf16.mxu1 %v8220_v45  ;;  %5789 = vmatprep.mubr.bf16.mxu0 %v463_v27  ;;  %v8261_v44 = vld [vmem:[%s10461_s1 + $0x9d8] sm:$0xff]   ;;  %v8287_v27 = vld [vmem:[%s10461_s1 + $0xa08] sm:$0xff]  }
 0x107   :  { %v8262_v45 = vld [vmem:[%s10461_s1 + $0x918] sm:$0xff]  }
 0x108   :  { %7512 = vmatpush3.bf16.msra.mxu0 %v8221_v46  ;;  %v8263_v46 = vld [vmem:[%s10461_s1 + $0x998] sm:$0xff]  }
 0x109   :  { %7534 = vmatpush3.bf16.msra.mxu1 %v8222_v47  ;;  %7513 = vmatprep.subr.bf16.mxu0 %v8223_v48  ;;  %v8264_v47 = vld [vmem:[%s10461_s1 + $0x960] sm:$0xff]  }
 0x10a   :  { %7535 = vmatprep.subr.bf16.mxu1 %v8224_v49  ;;  %v8265_v48 = vld [vmem:[%s10461_s1 + $0x9e0] sm:$0xff]  }
 0x10b   :  { %v8266_v49 = vld [vmem:[%s10461_s1 + $0x920] sm:$0xff]  }
 0x10c   :  { %7514 = vmatpush3.bf16.msra.mxu0 %v8225_v50  ;;  %v8267_v50 = vld [vmem:[%s10461_s1 + $0x9a0] sm:$0xff]  }
 0x10d   :  { %7536 = vmatpush3.bf16.msra.mxu1 %v8226_v51  ;;  %7515 = vmatprep.subr.bf16.mxu0 %v8227_v52  ;;  %v8268_v51 = vld [vmem:[%s10461_s1 + $0x968] sm:$0xff]  }
 0x10e   :  { %7537 = vmatprep.subr.bf16.mxu1 %v8228_v53  ;;  %v8269_v52 = vld [vmem:[%s10461_s1 + $0x9e8] sm:$0xff]  }
 0x10f   :  { %v8270_v53 = vld [vmem:[%s10461_s1 + $0x928] sm:$0xff]  }
 0x110   :  { %7516 = vmatpush3.bf16.msra.mxu0 %v8229_v54  ;;  %v8271_v54 = vld [vmem:[%s10461_s1 + $0x9a8] sm:$0xff]  }
 0x111   :  { %7538 = vmatpush3.bf16.msra.mxu1 %v8230_v55  ;;  %7517 = vmatprep.subr.bf16.mxu0 %v8231_v56  ;;  %v8272_v55 = vld [vmem:[%s10461_s1 + $0x970] sm:$0xff]  }
 0x112   :  { %7539 = vmatprep.subr.bf16.mxu1 %v8232_v57  ;;  %v8273_v56 = vld [vmem:[%s10461_s1 + $0x9f0] sm:$0xff]  }
 0x114   :  { %7518 = vmatpush3.bf16.msra.mxu0 %v8233_v58 }
 0x115   :  { %7540 = vmatpush3.bf16.msra.mxu1 %v8234_v59  ;;  %7519 = vmatprep.subr.bf16.mxu0 %v8235_v60  ;;  %v8274_v59 = vld [vmem:[%s10461_s1 + $0x930] sm:$0xff]  }
 0x116   :  { %7541 = vmatprep.subr.bf16.mxu1 %v8236_v61  ;;  %v7217_v2 = vpop.f32.mrb[4].mxu0  ;;  %v8275_v60 = vld [vmem:[%s10461_s1 + $0x9b0] sm:$0xff]  }
 0x117   :  { %v7239_v3 = vpop.f32.mrb[4].mxu1  ;;  %v7218_v6 = vpop.f32.mrb[5].mxu0 }
 0x118   :  { %v7240_v7 = vpop.f32.mrb[5].mxu1  ;;  %v7219_v9 = vadd.f32 %v7218_v6, %v7217_v2  ;;  %v7220_v11 = vpop.f32.mrb[6].mxu0  ;;  %7520 = vmatpush3.bf16.msra.mxu0 %v8237_v62  ;;  %v8277_v6 = vld [vmem:[%s10461_s1 + $0x9f8] sm:$0xff]  }
 0x119   :  { %v7241_v10 = vadd.f32 %v7240_v7, %v7239_v3  ;;  %v7242_v12 = vpop.f32.mrb[6].mxu1  ;;  %7542 = vmatpush3.bf16.msra.mxu1 %v8238_v63  ;;  %v7221_v13 = vpop.f32.mrb[7].mxu0  ;;  %7521 = vmatprep.subr.bf16.mxu0 %v8239_v0 }
 0x11a   :  { %v7243_v14 = vpop.f32.mrb[7].mxu1  ;;  %7543 = vmatprep.subr.bf16.mxu1 %v8240_v1  ;;  %v5232_v17 = vadd.f32 %v7219_v9, %v9408_v33  ;;  %v465_v33 = vpack.c.bf16 %v204_v28, %v204_v28  ;;  %v8278_v9 = vld [vmem:[%s10461_s1 + $0x938] sm:$0xff]   ;;  %v8288_v28 = vld [vmem:[%s10461_s1 + $0xa88] sm:$0xff]  }
 0x11b   :  { %v8279_v13 = vld [vmem:[%s10461_s1 + $0x9b8] sm:$0xff]  }
 0x11c   :  { %v9511_v22 = vadd.f32 %v7241_v10, %v5232_v17  ;;  %7522 = vmatpush3.bf16.msra.mxu0 %v8241_v4  ;;  %5829 = vmatprep.mubr.bf16.mxu1 %v465_v33  ;;  %v8282_v17 = vld [vmem:[%s10461_s1 + $0xac0] sm:$0xff]   ;;  %v8293_v33 = vld [vmem:[%s10461_s1 + $0xa58] sm:$0xff]  }
 0x11d   :  { %7544 = vmatpush3.bf16.msra.mxu1 %v8242_v5  ;;  %7523 = vmatprep.subr.bf16.mxu0 %v8243_v8  ;;  %v8276_v5 = vld [vmem:[%s10461_s1 + $0x978] sm:$0xff]   ;;  %v25_v8 = vld [vmem:[%s10460_s0 + $0x48] sm:$0xff] }
 0x11e   :  { %7545 = vmatprep.subr.bf16.mxu1 %v8244_v15  ;;  %v212_v10 = vrot.slane %v25_v8, %v8700_v41  ;;  %v205_v11 = vcombine.high %v25_v8, %v25_v8  ;;  %v8315_v8 = vld [vmem:[%s10461_s1 + $0xbc0] sm:$0xff]  }
 0x120   :  { %7524 = vmatpush3.bf16.msra.mxu0 %v8245_v18  ;;  %v220_v14 = vcombine.high %v212_v10, %v212_v10  ;;  %v219_v15 = vrot.slane %v205_v11, %v8700_v41  ;;  %v466_v20 = vpack.c.bf16 %v212_v10, %v212_v10  ;;  %v8316_v10 = vld [vmem:[%s10461_s1 + $0xb00] sm:$0xff]  }
 0x121   :  { %7546 = vmatpush3.bf16.msra.mxu1 %v8246_v21  ;;  %7553 = vmatprep.subr.bf16.mxu0 %v8248_v25  ;;  %v8283_v21 = vld [vmem:[%s10461_s1 + $0xa00] sm:$0xff]   ;;  %v8285_v25 = vld [vmem:[%s10461_s1 + $0xa48] sm:$0xff]  }
 0x122   :  { %7575 = vmatprep.subr.bf16.mxu1 %v8249_v26  ;;  %v467_v18 = vpack.c.bf16 %v220_v14, %v220_v14  ;;  %v221_v19 = vcombine.high %v219_v15, %v219_v15  ;;  %v8286_v26 = vld [vmem:[%s10461_s1 + $0xac8] sm:$0xff]  }
 0x123   :  { %5790 = vmatmul.mubr.bf16.vlgmr.msra.gmra.mrb[32].mxu0 %v462_v30  ;;  %v8290_v30 = vld [vmem:[%s10461_s1 + $0xad0] sm:$0xff]  }
 0x124   :  { %5830 = vmatmul.mubr.bf16.vlgmr.msra.gmra.mrb[32].mxu1 %v464_v31  ;;  %7554 = vmatpush3.bf16.msra.mxu0 %v8250_v29  ;;  %v469_v24 = vpack.c.bf16 %v221_v19, %v221_v19  ;;  %v8289_v29 = vld [vmem:[%s10461_s1 + $0xa50] sm:$0xff]   ;;  %v8321_v19 = vld [vmem:[%s10461_s1 + $0xb88] sm:$0xff]  }
 0x125   :  { %7576 = vmatpush3.bf16.msra.mxu1 %v8251_v32  ;;  %7555 = vmatprep.subr.bf16.mxu0 %v8252_v34  ;;  %v8291_v31 = vld [vmem:[%s10461_s1 + $0xa10] sm:$0xff]   ;;  %v8294_v34 = vld [vmem:[%s10461_s1 + $0xad8] sm:$0xff]  }
 0x126   :  { %7577 = vmatprep.subr.bf16.mxu1 %v8253_v35  ;;  %5869 = vmatprep.mubr.bf16.mxu0 %v467_v18  ;;  %v8292_v32 = vld [vmem:[%s10461_s1 + $0xa90] sm:$0xff]   ;;  %v8295_v35 = vld [vmem:[%s10461_s1 + $0xa18] sm:$0xff]   ;;  %v8320_v18 = vld [vmem:[%s10461_s1 + $0xb08] sm:$0xff]  }
 0x127   :  { %5909 = vmatprep.mubr.bf16.mxu1 %v469_v24  ;;  %v8326_v24 = vld [vmem:[%s10461_s1 + $0xb58] sm:$0xff]  }
 0x128   :  { %7556 = vmatpush3.bf16.msra.mxu0 %v8254_v36  ;;  %v8296_v36 = vld [vmem:[%s10461_s1 + $0xa98] sm:$0xff]  }
 0x129   :  { %7578 = vmatpush3.bf16.msra.mxu1 %v8255_v37  ;;  %7557 = vmatprep.subr.bf16.mxu0 %v8256_v38  ;;  %v8297_v37 = vld [vmem:[%s10461_s1 + $0xa60] sm:$0xff]  }
 0x12a   :  { %7579 = vmatprep.subr.bf16.mxu1 %v8257_v39  ;;  %v8298_v38 = vld [vmem:[%s10461_s1 + $0xae0] sm:$0xff]  }
 0x12b   :  { %v8299_v39 = vld [vmem:[%s10461_s1 + $0xa20] sm:$0xff]  }
 0x12c   :  { %7558 = vmatpush3.bf16.msra.mxu0 %v8258_v40  ;;  %v8300_v40 = vld [vmem:[%s10461_s1 + $0xaa0] sm:$0xff]  }
 0x12d   :  { %7580 = vmatpush3.bf16.msra.mxu1 %v8259_v42  ;;  %7559 = vmatprep.subr.bf16.mxu0 %v8260_v43  ;;  %v8301_v42 = vld [vmem:[%s10461_s1 + $0xa68] sm:$0xff]  }
 0x12e   :  { %7581 = vmatprep.subr.bf16.mxu1 %v8261_v44  ;;  %v8302_v43 = vld [vmem:[%s10461_s1 + $0xae8] sm:$0xff]  }
 0x12f   :  { %v8303_v44 = vld [vmem:[%s10461_s1 + $0xa28] sm:$0xff]  }
 0x130   :  { %7560 = vmatpush3.bf16.msra.mxu0 %v8262_v45  ;;  %v8304_v45 = vld [vmem:[%s10461_s1 + $0xaa8] sm:$0xff]  }
 0x131   :  { %7582 = vmatpush3.bf16.msra.mxu1 %v8263_v46  ;;  %7561 = vmatprep.subr.bf16.mxu0 %v8264_v47  ;;  %v8305_v46 = vld [vmem:[%s10461_s1 + $0xa70] sm:$0xff]  }
 0x132   :  { %7583 = vmatprep.subr.bf16.mxu1 %v8265_v48 }
 0x134   :  { %7562 = vmatpush3.bf16.msra.mxu0 %v8266_v49  ;;  %v8306_v49 = vld [vmem:[%s10461_s1 + $0xaf0] sm:$0xff]  }
 0x135   :  { %7584 = vmatpush3.bf16.msra.mxu1 %v8267_v50  ;;  %7563 = vmatprep.subr.bf16.mxu0 %v8268_v51  ;;  %v8307_v50 = vld [vmem:[%s10461_s1 + $0xa30] sm:$0xff]  }
 0x136   :  { %7585 = vmatprep.subr.bf16.mxu1 %v8269_v52  ;;  %v7261_v57 = vpop.f32.mrb[8].mxu0 }
 0x137   :  { %v7283_v58 = vpop.f32.mrb[8].mxu1  ;;  %v7262_v61 = vpop.f32.mrb[9].mxu0 }
 0x138   :  { %v7284_v62 = vpop.f32.mrb[9].mxu1  ;;  %v7263_v63 = vadd.f32 %v7262_v61, %v7261_v57  ;;  %v7264_v1 = vpop.f32.mrb[10].mxu0  ;;  %7564 = vmatpush3.bf16.msra.mxu0 %v8270_v53  ;;  %v8308_v53 = vld [vmem:[%s10461_s1 + $0xab0] sm:$0xff]   ;;  %v8310_v61 = vld [vmem:[%s10461_s1 + $0xaf8] sm:$0xff]  }
 0x139   :  { %v7285_v0 = vadd.f32 %v7284_v62, %v7283_v58  ;;  %v7286_v2 = vpop.f32.mrb[10].mxu1  ;;  %7586 = vmatpush3.bf16.msra.mxu1 %v8271_v54  ;;  %v7265_v3 = vpop.f32.mrb[11].mxu0  ;;  %7565 = vmatprep.subr.bf16.mxu0 %v8272_v55 }
 0x13a   :  { %v7287_v4 = vpop.f32.mrb[11].mxu1  ;;  %7587 = vmatprep.subr.bf16.mxu1 %v8273_v56  ;;  %v5312_v7 = vadd.f32 %v7263_v63, %v9511_v22  ;;  %v468_v22 = vpack.c.bf16 %v219_v15, %v219_v15  ;;  %v8311_v63 = vld [vmem:[%s10461_s1 + $0xa38] sm:$0xff]   ;;  %v8318_v15 = vld [vmem:[%s10461_s1 + $0xb48] sm:$0xff]  }
 0x13b   :  { %v8312_v2 = vld [vmem:[%s10461_s1 + $0xab8] sm:$0xff]  }
 0x13c   :  { %v9612_v12 = vadd.f32 %v7285_v0, %v5312_v7  ;;  %7566 = vmatpush3.bf16.msra.mxu0 %v8274_v59  ;;  %v26_v0 = vld [vmem:[%s10460_s0 + $0x50] sm:$0xff] }
 0x13d   :  { %7588 = vmatpush3.bf16.msra.mxu1 %v8275_v60  ;;  %7567 = vmatprep.subr.bf16.mxu0 %v8276_v5  ;;  %v8309_v60 = vld [vmem:[%s10461_s1 + $0xa78] sm:$0xff]   ;;  %v229_v3 = vrot.slane %v26_v0, %v8700_v41  ;;  %v222_v4 = vcombine.high %v26_v0, %v26_v0  ;;  %v8314_v5 = vld [vmem:[%s10461_s1 + $0xb40] sm:$0xff]  }
 0x13e   :  { %7589 = vmatprep.subr.bf16.mxu1 %v8277_v6 }
 0x13f   :  { %v237_v6 = vcombine.high %v229_v3, %v229_v3  ;;  %v236_v7 = vrot.slane %v222_v4, %v8700_v41  ;;  %v8350_v4 = vld [vmem:[%s10461_s1 + $0xc80] sm:$0xff]  }
 0x140   :  { %7568 = vmatpush3.bf16.msra.mxu0 %v8278_v9  ;;  %v470_v9 = vpack.c.bf16 %v229_v3, %v229_v3 }
 0x141   :  { %7590 = vmatpush3.bf16.msra.mxu1 %v8279_v13  ;;  %7597 = vmatprep.subr.bf16.mxu0 %v8281_v16  ;;  %v471_v11 = vpack.c.bf16 %v237_v6, %v237_v6  ;;  %v8317_v13 = vld [vmem:[%s10461_s1 + $0xb80] sm:$0xff]   ;;  %v472_v14 = vpack.c.bf16 %v236_v7, %v236_v7  ;;  %v8351_v6 = vld [vmem:[%s10461_s1 + $0xc48] sm:$0xff]  }
 0x142   :  { %7619 = vmatprep.subr.bf16.mxu1 %v8282_v17  ;;  %v8319_v17 = vld [vmem:[%s10461_s1 + $0xbc8] sm:$0xff]  }
 0x143   :  { %5870 = vmatmul.mubr.bf16.vlgmr.msra.gmra.mrb[36].mxu0 %v466_v20  ;;  %v8322_v20 = vld [vmem:[%s10461_s1 + $0xb50] sm:$0xff]  }
 0x144   :  { %5910 = vmatmul.mubr.bf16.vlgmr.msra.gmra.mrb[36].mxu1 %v468_v22  ;;  %7598 = vmatpush3.bf16.msra.mxu0 %v8283_v21  ;;  %v8323_v21 = vld [vmem:[%s10461_s1 + $0xbd0] sm:$0xff]  }
 0x145   :  { %7620 = vmatpush3.bf16.msra.mxu1 %v8284_v23  ;;  %7599 = vmatprep.subr.bf16.mxu0 %v8285_v25  ;;  %v8324_v22 = vld [vmem:[%s10461_s1 + $0xb10] sm:$0xff]   ;;  %v8327_v25 = vld [vmem:[%s10461_s1 + $0xbd8] sm:$0xff]  }
 0x146   :  { %7621 = vmatprep.subr.bf16.mxu1 %v8286_v26  ;;  %5949 = vmatprep.mubr.bf16.mxu0 %v471_v11  ;;  %v8325_v23 = vld [vmem:[%s10461_s1 + $0xb90] sm:$0xff]   ;;  %v8328_v26 = vld [vmem:[%s10461_s1 + $0xb18] sm:$0xff]  }
 0x147   :  { %v8355_v11 = vld [vmem:[%s10461_s1 + $0xc50] sm:$0xff]  }
 0x148   :  { %7600 = vmatpush3.bf16.msra.mxu0 %v8287_v27  ;;  %v8329_v27 = vld [vmem:[%s10461_s1 + $0xb98] sm:$0xff]  }
 0x149   :  { %7622 = vmatpush3.bf16.msra.mxu1 %v8288_v28  ;;  %7601 = vmatprep.subr.bf16.mxu0 %v8289_v29  ;;  %v8330_v28 = vld [vmem:[%s10461_s1 + $0xb60] sm:$0xff]  }
 0x14a   :  { %7623 = vmatprep.subr.bf16.mxu1 %v8290_v30  ;;  %v8331_v29 = vld [vmem:[%s10461_s1 + $0xbe0] sm:$0xff]  }
 0x14b   :  { %v8332_v30 = vld [vmem:[%s10461_s1 + $0xb20] sm:$0xff]  }
 0x14c   :  { %7602 = vmatpush3.bf16.msra.mxu0 %v8291_v31  ;;  %v8333_v31 = vld [vmem:[%s10461_s1 + $0xba0] sm:$0xff]  }
 0x14d   :  { %7624 = vmatpush3.bf16.msra.mxu1 %v8292_v32  ;;  %7603 = vmatprep.subr.bf16.mxu0 %v8293_v33  ;;  %v8334_v32 = vld [vmem:[%s10461_s1 + $0xb68] sm:$0xff]  }
 0x14e   :  { %7625 = vmatprep.subr.bf16.mxu1 %v8294_v34  ;;  %v8335_v33 = vld [vmem:[%s10461_s1 + $0xbe8] sm:$0xff]  }
 0x14f   :  { %v8336_v34 = vld [vmem:[%s10461_s1 + $0xb28] sm:$0xff]  }
 0x150   :  { %7604 = vmatpush3.bf16.msra.mxu0 %v8295_v35  ;;  %v8337_v35 = vld [vmem:[%s10461_s1 + $0xba8] sm:$0xff]  }
 0x151   :  { %7626 = vmatpush3.bf16.msra.mxu1 %v8296_v36  ;;  %7605 = vmatprep.subr.bf16.mxu0 %v8297_v37  ;;  %v8338_v36 = vld [vmem:[%s10461_s1 + $0xb70] sm:$0xff]  }
 0x152   :  { %7627 = vmatprep.subr.bf16.mxu1 %v8298_v38 }
 0x154   :  { %7606 = vmatpush3.bf16.msra.mxu0 %v8299_v39  ;;  %v8339_v39 = vld [vmem:[%s10461_s1 + $0xbf0] sm:$0xff]  }
 0x155   :  { %7628 = vmatpush3.bf16.msra.mxu1 %v8300_v40  ;;  %7607 = vmatprep.subr.bf16.mxu0 %v8301_v42  ;;  %v8340_v40 = vld [vmem:[%s10461_s1 + $0xb30] sm:$0xff]  }
 0x156   :  { %v7305_v47 = vpop.f32.mrb[12].mxu0  ;;  %7629 = vmatprep.subr.bf16.mxu1 %v8302_v43 }
 0x157   :  { %v7327_v48 = vpop.f32.mrb[12].mxu1  ;;  %v7306_v51 = vpop.f32.mrb[13].mxu0 }
 0x158   :  { %v7328_v52 = vpop.f32.mrb[13].mxu1  ;;  %v7307_v54 = vadd.f32 %v7306_v51, %v7305_v47  ;;  %v7308_v56 = vpop.f32.mrb[14].mxu0  ;;  %7608 = vmatpush3.bf16.msra.mxu0 %v8303_v44  ;;  %v8342_v51 = vld [vmem:[%s10461_s1 + $0xb78] sm:$0xff]  }
 0x159   :  { %v7329_v55 = vadd.f32 %v7328_v52, %v7327_v48  ;;  %v7330_v57 = vpop.f32.mrb[14].mxu1  ;;  %7630 = vmatpush3.bf16.msra.mxu1 %v8304_v45  ;;  %v7309_v58 = vpop.f32.mrb[15].mxu0  ;;  %7609 = vmatprep.subr.bf16.mxu0 %v8305_v46  ;;  %v27_v56 = vld [vmem:[%s10460_s0 + $0x58] sm:$0xff] }
 0x15a   :  { %v7331_v59 = vpop.f32.mrb[15].mxu1  ;;  %v5392_v62 = vadd.f32 %v7307_v54, %v9612_v12  ;;  %7631 = vmatprep.subr.bf16.mxu1 %v8306_v49  ;;  %v238_v12 = vcombine.high %v236_v7, %v236_v7  ;;  %v246_v57 = vrot.slane %v27_v56, %v8700_v41  ;;  %v239_v58 = vcombine.high %v27_v56, %v27_v56  ;;  %v8382_v56 = vld [vmem:[%s10461_s1 + $0xd00] sm:$0xff]  }
 0x15b   :  { %v8347_v59 = vld [vmem:[%s10461_s1 + $0xc40] sm:$0xff]  }
 0x15c   :  { %v9715_v1 = vadd.f32 %v7329_v55, %v5392_v62  ;;  %7610 = vmatpush3.bf16.msra.mxu0 %v8307_v50  ;;  %v473_v16 = vpack.c.bf16 %v238_v12, %v238_v12  ;;  %v8341_v50 = vld [vmem:[%s10461_s1 + $0xbb0] sm:$0xff]   ;;  %v8344_v55 = vld [vmem:[%s10461_s1 + $0xb38] sm:$0xff]   ;;  %v253_v62 = vrot.slane %v239_v58, %v8700_v41  ;;  %v474_v0 = vpack.c.bf16 %v246_v57, %v246_v57 }
 0x15d   :  { %7632 = vmatpush3.bf16.msra.mxu1 %v8308_v53  ;;  %7611 = vmatprep.subr.bf16.mxu0 %v8309_v60  ;;  %v8343_v53 = vld [vmem:[%s10461_s1 + $0xbf8] sm:$0xff]   ;;  %v8356_v12 = vld [vmem:[%s10461_s1 + $0xcd0] sm:$0xff]  }
 0x15e   :  { %7633 = vmatprep.subr.bf16.mxu1 %v8310_v61  ;;  %5989 = vmatprep.mubr.bf16.mxu1 %v473_v16  ;;  %v8345_v60 = vld [vmem:[%s10461_s1 + $0xbb8] sm:$0xff]   ;;  %v254_v61 = vcombine.high %v246_v57, %v246_v57  ;;  %v255_v3 = vcombine.high %v253_v62, %v253_v62 }
 0x15f   :  { %v8360_v16 = vld [vmem:[%s10461_s1 + $0xcd8] sm:$0xff]  }
 0x160   :  { %7612 = vmatpush3.bf16.msra.mxu0 %v8311_v63  ;;  %v8348_v63 = vld [vmem:[%s10461_s1 + $0xcc0] sm:$0xff]   ;;  %v477_v7 = vpack.c.bf16 %v255_v3, %v255_v3  ;;  %v8389_v3 = vld [vmem:[%s10461_s1 + $0xdd0] sm:$0xff]  }
 0x161   :  { %7634 = vmatpush3.bf16.msra.mxu1 %v8312_v2  ;;  %7641 = vmatprep.subr.bf16.mxu0 %v8314_v5  ;;  %v475_v2 = vpack.c.bf16 %v254_v61, %v254_v61  ;;  %v476_v5 = vpack.c.bf16 %v253_v62, %v253_v62  ;;  %v8384_v61 = vld [vmem:[%s10461_s1 + $0xd48] sm:$0xff]  }
 0x162   :  { %7663 = vmatprep.subr.bf16.mxu1 %v8315_v8  ;;  %v8352_v8 = vld [vmem:[%s10461_s1 + $0xcc8] sm:$0xff]  }
 0x163   :  { %5950 = vmatmul.mubr.bf16.vlgmr.msra.gmra.mrb[40].mxu0 %v470_v9  ;;  %v8353_v9 = vld [vmem:[%s10461_s1 + $0xc08] sm:$0xff]  }
 0x164   :  { %7642 = vmatpush3.bf16.msra.mxu0 %v8316_v10  ;;  %5990 = vmatmul.mubr.bf16.vlgmr.msra.gmra.mrb[40].mxu1 %v472_v14  ;;  %v8354_v10 = vld [vmem:[%s10461_s1 + $0xc88] sm:$0xff]   ;;  %v8358_v14 = vld [vmem:[%s10461_s1 + $0xc90] sm:$0xff]  }
 0x165   :  { %7643 = vmatprep.subr.bf16.mxu0 %v8318_v15  ;;  %7664 = vmatpush3.bf16.msra.mxu1 %v8317_v13  ;;  %v8357_v13 = vld [vmem:[%s10461_s1 + $0xc10] sm:$0xff]   ;;  %v8359_v15 = vld [vmem:[%s10461_s1 + $0xc58] sm:$0xff]  }
 0x166   :  { %7665 = vmatprep.subr.bf16.mxu1 %v8319_v17  ;;  %6029 = vmatprep.mubr.bf16.mxu0 %v475_v2  ;;  %v8361_v17 = vld [vmem:[%s10461_s1 + $0xc18] sm:$0xff]   ;;  %v8388_v2 = vld [vmem:[%s10461_s1 + $0xd50] sm:$0xff]  }
 0x167   :  { %6069 = vmatprep.mubr.bf16.mxu1 %v477_v7  ;;  %v8393_v7 = vld [vmem:[%s10461_s1 + $0xdd8] sm:$0xff]  }
 0x168   :  { %7644 = vmatpush3.bf16.msra.mxu0 %v8320_v18  ;;  %v8362_v18 = vld [vmem:[%s10461_s1 + $0xc98] sm:$0xff]  }
 0x169   :  { %7645 = vmatprep.subr.bf16.mxu0 %v8322_v20  ;;  %7666 = vmatpush3.bf16.msra.mxu1 %v8321_v19  ;;  %v8363_v19 = vld [vmem:[%s10461_s1 + $0xc60] sm:$0xff]  }
 0x16a   :  { %7667 = vmatprep.subr.bf16.mxu1 %v8323_v21  ;;  %v8364_v20 = vld [vmem:[%s10461_s1 + $0xce0] sm:$0xff]  }
 0x16b   :  { %v8365_v21 = vld [vmem:[%s10461_s1 + $0xc20] sm:$0xff]  }
 0x16c   :  { %7646 = vmatpush3.bf16.msra.mxu0 %v8324_v22  ;;  %v8366_v22 = vld [vmem:[%s10461_s1 + $0xca0] sm:$0xff]  }
 0x16d   :  { %7647 = vmatprep.subr.bf16.mxu0 %v8326_v24  ;;  %7668 = vmatpush3.bf16.msra.mxu1 %v8325_v23  ;;  %v8367_v23 = vld [vmem:[%s10461_s1 + $0xc68] sm:$0xff]  }
 0x16e   :  { %7669 = vmatprep.subr.bf16.mxu1 %v8327_v25  ;;  %v8368_v24 = vld [vmem:[%s10461_s1 + $0xce8] sm:$0xff]  }
 0x16f   :  { %v8369_v25 = vld [vmem:[%s10461_s1 + $0xc28] sm:$0xff]  }
 0x170   :  { %7648 = vmatpush3.bf16.msra.mxu0 %v8328_v26  ;;  %v8370_v26 = vld [vmem:[%s10461_s1 + $0xca8] sm:$0xff]  }
 0x171   :  { %7649 = vmatprep.subr.bf16.mxu0 %v8330_v28  ;;  %7670 = vmatpush3.bf16.msra.mxu1 %v8329_v27 }
 0x172   :  { %7671 = vmatprep.subr.bf16.mxu1 %v8331_v29  ;;  %v8371_v29 = vld [vmem:[%s10461_s1 + $0xc70] sm:$0xff]  }
 0x174   :  { %7650 = vmatpush3.bf16.msra.mxu0 %v8332_v30  ;;  %v8372_v30 = vld [vmem:[%s10461_s1 + $0xcf0] sm:$0xff]  }
 0x175   :  { %7651 = vmatprep.subr.bf16.mxu0 %v8334_v32  ;;  %7672 = vmatpush3.bf16.msra.mxu1 %v8333_v31 }
 0x176   :  { %v7349_v37 = vpop.f32.mrb[16].mxu0  ;;  %7673 = vmatprep.subr.bf16.mxu1 %v8335_v33 }
 0x177   :  { %v7371_v38 = vpop.f32.mrb[16].mxu1  ;;  %v7350_v42 = vpop.f32.mrb[17].mxu0 }
 0x178   :  { %v7372_v43 = vpop.f32.mrb[17].mxu1  ;;  %v7351_v44 = vadd.f32 %v7350_v42, %v7349_v37  ;;  %v7352_v46 = vpop.f32.mrb[18].mxu0  ;;  %7652 = vmatpush3.bf16.msra.mxu0 %v8336_v34 }
 0x179   :  { %v7373_v45 = vadd.f32 %v7372_v43, %v7371_v38  ;;  %v7374_v47 = vpop.f32.mrb[18].mxu1  ;;  %v7353_v48 = vpop.f32.mrb[19].mxu0  ;;  %7653 = vmatprep.subr.bf16.mxu0 %v8338_v36  ;;  %7674 = vmatpush3.bf16.msra.mxu1 %v8337_v35  ;;  %v8374_v43 = vld [vmem:[%s10461_s1 + $0xcb0] sm:$0xff]   ;;  %v8377_v46 = vld [vmem:[%s10461_s1 + $0xc38] sm:$0xff]  }
 0x17a   :  { %v7375_v49 = vpop.f32.mrb[19].mxu1  ;;  %v5472_v52 = vadd.f32 %v7351_v44, %v9715_v1  ;;  %7675 = vmatprep.subr.bf16.mxu1 %v8339_v39  ;;  %v8349_v1 = vld [vmem:[%s10461_s1 + $0xc00] sm:$0xff]   ;;  %v8373_v39 = vld [vmem:[%s10461_s1 + $0xc30] sm:$0xff]  }
 0x17b   :  { %v28_v47 = vld [vmem:[%s10460_s0 + $0x60] sm:$0xff] }
 0x17c   :  { %v9813_v54 = vadd.f32 %v7373_v45, %v5472_v52  ;;  %7654 = vmatpush3.bf16.msra.mxu0 %v8340_v40  ;;  %v8375_v40 = vld [vmem:[%s10461_s1 + $0xc78] sm:$0xff]   ;;  %v263_v48 = vrot.slane %v28_v47, %v8700_v41  ;;  %v256_v49 = vcombine.high %v28_v47, %v28_v47  ;;  %v8415_v47 = vld [vmem:[%s10461_s1 + $0xe00] sm:$0xff]  }
 0x17d   :  { %7655 = vmatprep.subr.bf16.mxu0 %v8342_v51  ;;  %7676 = vmatpush3.bf16.msra.mxu1 %v8341_v50  ;;  %v8376_v45 = vld [vmem:[%s10461_s1 + $0xcf8] sm:$0xff]   ;;  %v8380_v50 = vld [vmem:[%s10461_s1 + $0xd40] sm:$0xff]  }
 0x17e   :  { %7677 = vmatprep.subr.bf16.mxu1 %v8343_v53  ;;  %v8378_v51 = vld [vmem:[%s10461_s1 + $0xcb8] sm:$0xff]   ;;  %v271_v52 = vcombine.high %v263_v48, %v263_v48  ;;  %v270_v53 = vrot.slane %v256_v49, %v8700_v41 }
 0x180   :  { %7656 = vmatpush3.bf16.msra.mxu0 %v8344_v55  ;;  %v478_v55 = vpack.c.bf16 %v263_v48, %v263_v48  ;;  %v479_v57 = vpack.c.bf16 %v271_v52, %v271_v52  ;;  %v272_v58 = vcombine.high %v270_v53, %v270_v53  ;;  %v8417_v52 = vld [vmem:[%s10461_s1 + $0xe48] sm:$0xff]  }
 0x181   :  { %7685 = vmatprep.subr.bf16.mxu0 %v8347_v59  ;;  %7678 = vmatpush3.bf16.msra.mxu1 %v8345_v60  ;;  %v8383_v59 = vld [vmem:[%s10461_s1 + $0xd80] sm:$0xff]   ;;  %v480_v60 = vpack.c.bf16 %v270_v53, %v270_v53 }
 0x182   :  { %7707 = vmatprep.subr.bf16.mxu1 %v8348_v63  ;;  %v481_v62 = vpack.c.bf16 %v272_v58, %v272_v58  ;;  %v8385_v63 = vld [vmem:[%s10461_s1 + $0xdc8] sm:$0xff]   ;;  %v8422_v58 = vld [vmem:[%s10461_s1 + $0xed0] sm:$0xff]  }
 0x183   :  { %6030 = vmatmul.mubr.bf16.vlgmr.msra.gmra.mrb[44].mxu0 %v474_v0  ;;  %v8386_v0 = vld [vmem:[%s10461_s1 + $0xd08] sm:$0xff]  }
 0x184   :  { %7686 = vmatpush3.bf16.msra.mxu0 %v8349_v1  ;;  %6070 = vmatmul.mubr.bf16.vlgmr.msra.gmra.mrb[44].mxu1 %v476_v5  ;;  %v8387_v1 = vld [vmem:[%s10461_s1 + $0xd88] sm:$0xff]   ;;  %v8391_v5 = vld [vmem:[%s10461_s1 + $0xd90] sm:$0xff]  }
 0x185   :  { %7687 = vmatprep.subr.bf16.mxu0 %v8351_v6  ;;  %7708 = vmatpush3.bf16.msra.mxu1 %v8350_v4  ;;  %v8390_v4 = vld [vmem:[%s10461_s1 + $0xd10] sm:$0xff]   ;;  %v8392_v6 = vld [vmem:[%s10461_s1 + $0xd58] sm:$0xff]  }
 0x186   :  { %7709 = vmatprep.subr.bf16.mxu1 %v8352_v8  ;;  %6109 = vmatprep.mubr.bf16.mxu0 %v479_v57  ;;  %v8394_v8 = vld [vmem:[%s10461_s1 + $0xd18] sm:$0xff]   ;;  %v8421_v57 = vld [vmem:[%s10461_s1 + $0xe50] sm:$0xff]  }
 0x187   :  { %6149 = vmatprep.mubr.bf16.mxu1 %v481_v62  ;;  %v8426_v62 = vld [vmem:[%s10461_s1 + $0xed8] sm:$0xff]  }
 0x188   :  { %7688 = vmatpush3.bf16.msra.mxu0 %v8353_v9  ;;  %v8395_v9 = vld [vmem:[%s10461_s1 + $0xd98] sm:$0xff]  }
 0x189   :  { %7689 = vmatprep.subr.bf16.mxu0 %v8355_v11  ;;  %7710 = vmatpush3.bf16.msra.mxu1 %v8354_v10  ;;  %v8396_v10 = vld [vmem:[%s10461_s1 + $0xd60] sm:$0xff]  }
 0x18a   :  { %7711 = vmatprep.subr.bf16.mxu1 %v8356_v12  ;;  %v8397_v11 = vld [vmem:[%s10461_s1 + $0xde0] sm:$0xff]  }
 0x18b   :  { %v8398_v12 = vld [vmem:[%s10461_s1 + $0xd20] sm:$0xff]  }
 0x18c   :  { %7690 = vmatpush3.bf16.msra.mxu0 %v8357_v13  ;;  %v8399_v13 = vld [vmem:[%s10461_s1 + $0xda0] sm:$0xff]  }
 0x18d   :  { %7691 = vmatprep.subr.bf16.mxu0 %v8359_v15  ;;  %7712 = vmatpush3.bf16.msra.mxu1 %v8358_v14  ;;  %v8400_v14 = vld [vmem:[%s10461_s1 + $0xd68] sm:$0xff]  }
 0x18e   :  { %7713 = vmatprep.subr.bf16.mxu1 %v8360_v16  ;;  %v8401_v15 = vld [vmem:[%s10461_s1 + $0xde8] sm:$0xff]  }
 0x18f   :  { %v8402_v16 = vld [vmem:[%s10461_s1 + $0xd28] sm:$0xff]  }
 0x190   :  { %7692 = vmatpush3.bf16.msra.mxu0 %v8361_v17 }
 0x191   :  { %7693 = vmatprep.subr.bf16.mxu0 %v8363_v19  ;;  %7714 = vmatpush3.bf16.msra.mxu1 %v8362_v18  ;;  %v8403_v19 = vld [vmem:[%s10461_s1 + $0xda8] sm:$0xff]  }
 0x192   :  { %7715 = vmatprep.subr.bf16.mxu1 %v8364_v20  ;;  %v8404_v20 = vld [vmem:[%s10461_s1 + $0xd70] sm:$0xff]  }
 0x194   :  { %7694 = vmatpush3.bf16.msra.mxu0 %v8365_v21 }
 0x195   :  { %7695 = vmatprep.subr.bf16.mxu0 %v8367_v23  ;;  %7716 = vmatpush3.bf16.msra.mxu1 %v8366_v22 }
 0x196   :  { %v7393_v27 = vpop.f32.mrb[20].mxu0  ;;  %7717 = vmatprep.subr.bf16.mxu1 %v8368_v24 }
 0x197   :  { %v7415_v28 = vpop.f32.mrb[20].mxu1  ;;  %v7394_v31 = vpop.f32.mrb[21].mxu0 }
 0x198   :  { %v7416_v32 = vpop.f32.mrb[21].mxu1  ;;  %v7395_v33 = vadd.f32 %v7394_v31, %v7393_v27  ;;  %v7396_v35 = vpop.f32.mrb[22].mxu0  ;;  %7696 = vmatpush3.bf16.msra.mxu0 %v8369_v25 }
 0x199   :  { %v7417_v34 = vadd.f32 %v7416_v32, %v7415_v28  ;;  %v7418_v36 = vpop.f32.mrb[22].mxu1  ;;  %v7397_v37 = vpop.f32.mrb[23].mxu0  ;;  %7697 = vmatprep.subr.bf16.mxu0 %v8371_v29  ;;  %7718 = vmatpush3.bf16.msra.mxu1 %v8370_v26  ;;  %v8405_v29 = vld [vmem:[%s10461_s1 + $0xdf0] sm:$0xff]   ;;  %v8408_v32 = vld [vmem:[%s10461_s1 + $0xd78] sm:$0xff]  }
 0x19a   :  { %v7419_v38 = vpop.f32.mrb[23].mxu1  ;;  %v5552_v42 = vadd.f32 %v7395_v33, %v9813_v54  ;;  %7719 = vmatprep.subr.bf16.mxu1 %v8372_v30  ;;  %v8381_v54 = vld [vmem:[%s10461_s1 + $0xdc0] sm:$0xff]   ;;  %v8406_v30 = vld [vmem:[%s10461_s1 + $0xd30] sm:$0xff]   ;;  %v8409_v35 = vld [vmem:[%s10461_s1 + $0xdf8] sm:$0xff]  }
 0x19b   :  { %v8410_v36 = vld [vmem:[%s10461_s1 + $0xd38] sm:$0xff]   ;;  %v29_v37 = vld [vmem:[%s10460_s0 + $0x68] sm:$0xff] }
 0x19c   :  { %v9914_v44 = vadd.f32 %v7417_v34, %v5552_v42  ;;  %7698 = vmatpush3.bf16.msra.mxu0 %v8373_v39  ;;  %v8407_v34 = vld [vmem:[%s10461_s1 + $0xdb0] sm:$0xff]   ;;  %v280_v38 = vrot.slane %v29_v37, %v8700_v41  ;;  %v273_v39 = vcombine.high %v29_v37, %v29_v37  ;;  %v8411_v42 = vld [vmem:[%s10461_s1 + $0xdb8] sm:$0xff]   ;;  %v8448_v37 = vld [vmem:[%s10461_s1 + $0xf00] sm:$0xff]  }
 0x19d   :  { %7699 = vmatprep.subr.bf16.mxu0 %v8375_v40  ;;  %7720 = vmatpush3.bf16.msra.mxu1 %v8374_v43  ;;  %v8413_v40 = vld [vmem:[%s10461_s1 + $0xe40] sm:$0xff]  }
 0x19e   :  { %7721 = vmatprep.subr.bf16.mxu1 %v8376_v45  ;;  %v288_v43 = vcombine.high %v280_v38, %v280_v38  ;;  %v8414_v45 = vld [vmem:[%s10461_s1 + $0xec0] sm:$0xff]  }
 0x1a0   :  { %7700 = vmatpush3.bf16.msra.mxu0 %v8377_v46  ;;  %v482_v46 = vpack.c.bf16 %v280_v38, %v280_v38  ;;  %v483_v48 = vpack.c.bf16 %v288_v43, %v288_v43  ;;  %v8450_v43 = vld [vmem:[%s10461_s1 + $0xf48] sm:$0xff]  }
 0x1a1   :  { %7729 = vmatprep.subr.bf16.mxu0 %v8380_v50  ;;  %7722 = vmatpush3.bf16.msra.mxu1 %v8378_v51  ;;  %v8416_v50 = vld [vmem:[%s10461_s1 + $0xe80] sm:$0xff]  }
 0x1a2   :  { %7751 = vmatprep.subr.bf16.mxu1 %v8381_v54  ;;  %v8418_v54 = vld [vmem:[%s10461_s1 + $0xec8] sm:$0xff]  }
 0x1a3   :  { %6110 = vmatmul.mubr.bf16.vlgmr.msra.gmra.mrb[48].mxu0 %v478_v55  ;;  %v8419_v55 = vld [vmem:[%s10461_s1 + $0xe08] sm:$0xff]  }
 0x1a4   :  { %7730 = vmatpush3.bf16.msra.mxu0 %v8382_v56  ;;  %6150 = vmatmul.mubr.bf16.vlgmr.msra.gmra.mrb[48].mxu1 %v480_v60  ;;  %v8420_v56 = vld [vmem:[%s10461_s1 + $0xe88] sm:$0xff]   ;;  %v8424_v60 = vld [vmem:[%s10461_s1 + $0xe90] sm:$0xff]  }
 0x1a5   :  { %7731 = vmatprep.subr.bf16.mxu0 %v8384_v61  ;;  %7752 = vmatpush3.bf16.msra.mxu1 %v8383_v59  ;;  %v8423_v59 = vld [vmem:[%s10461_s1 + $0xe10] sm:$0xff]   ;;  %v8425_v61 = vld [vmem:[%s10461_s1 + $0xe58] sm:$0xff]  }
 0x1a6   :  { %7753 = vmatprep.subr.bf16.mxu1 %v8385_v63  ;;  %6189 = vmatprep.mubr.bf16.mxu0 %v483_v48  ;;  %v8427_v63 = vld [vmem:[%s10461_s1 + $0xe18] sm:$0xff]   ;;  %v8454_v48 = vld [vmem:[%s10461_s1 + $0xf50] sm:$0xff]  }
 0x1a8   :  { %7732 = vmatpush3.bf16.msra.mxu0 %v8386_v0  ;;  %v8428_v0 = vld [vmem:[%s10461_s1 + $0xe98] sm:$0xff]  }
 0x1a9   :  { %7733 = vmatprep.subr.bf16.mxu0 %v8388_v2  ;;  %7754 = vmatpush3.bf16.msra.mxu1 %v8387_v1  ;;  %v8429_v1 = vld [vmem:[%s10461_s1 + $0xe60] sm:$0xff]  }
 0x1aa   :  { %7755 = vmatprep.subr.bf16.mxu1 %v8389_v3  ;;  %v8430_v2 = vld [vmem:[%s10461_s1 + $0xee0] sm:$0xff]  }
 0x1ab   :  { %v8431_v3 = vld [vmem:[%s10461_s1 + $0xe20] sm:$0xff]  }
 0x1ac   :  { %7734 = vmatpush3.bf16.msra.mxu0 %v8390_v4  ;;  %v8432_v4 = vld [vmem:[%s10461_s1 + $0xea0] sm:$0xff]  }
 0x1ad   :  { %7735 = vmatprep.subr.bf16.mxu0 %v8392_v6  ;;  %7756 = vmatpush3.bf16.msra.mxu1 %v8391_v5  ;;  %v8433_v5 = vld [vmem:[%s10461_s1 + $0xe68] sm:$0xff]  }
 0x1ae   :  { %7757 = vmatprep.subr.bf16.mxu1 %v8393_v7  ;;  %v8434_v6 = vld [vmem:[%s10461_s1 + $0xee8] sm:$0xff]  }
 0x1b0   :  { %7736 = vmatpush3.bf16.msra.mxu0 %v8394_v8 }
 0x1b1   :  { %7737 = vmatprep.subr.bf16.mxu0 %v8396_v10  ;;  %7758 = vmatpush3.bf16.msra.mxu1 %v8395_v9  ;;  %v8435_v9 = vld [vmem:[%s10461_s1 + $0xe28] sm:$0xff]   ;;  %v8437_v10 = vld [vmem:[%s10461_s1 + $0xe70] sm:$0xff]  }
 0x1b2   :  { %7759 = vmatprep.subr.bf16.mxu1 %v8397_v11 }
 0x1b4   :  { %7738 = vmatpush3.bf16.msra.mxu0 %v8398_v12 }
 0x1b5   :  { %7739 = vmatprep.subr.bf16.mxu0 %v8400_v14  ;;  %7760 = vmatpush3.bf16.msra.mxu1 %v8399_v13 }
 0x1b6   :  { %v7437_v17 = vpop.f32.mrb[24].mxu0  ;;  %7761 = vmatprep.subr.bf16.mxu1 %v8401_v15 }
 0x1b7   :  { %v7459_v18 = vpop.f32.mrb[24].mxu1  ;;  %v7438_v21 = vpop.f32.mrb[25].mxu0 }
 0x1b8   :  { %v7460_v22 = vpop.f32.mrb[25].mxu1  ;;  %v7439_v23 = vadd.f32 %v7438_v21, %v7437_v17  ;;  %v7440_v25 = vpop.f32.mrb[26].mxu0  ;;  %7740 = vmatpush3.bf16.msra.mxu0 %v8402_v16  ;;  %v8436_v17 = vld [vmem:[%s10461_s1 + $0xea8] sm:$0xff]  }
 0x1b9   :  { %v7461_v24 = vadd.f32 %v7460_v22, %v7459_v18  ;;  %v7462_v26 = vpop.f32.mrb[26].mxu1  ;;  %v7441_v27 = vpop.f32.mrb[27].mxu0  ;;  %7741 = vmatprep.subr.bf16.mxu0 %v8404_v20  ;;  %7762 = vmatpush3.bf16.msra.mxu1 %v8403_v19  ;;  %v8438_v20 = vld [vmem:[%s10461_s1 + $0xef0] sm:$0xff]  }
 0x1ba   :  { %v7463_v28 = vpop.f32.mrb[27].mxu1  ;;  %v5632_v31 = vadd.f32 %v7439_v23, %v9914_v44  ;;  %7763 = vmatprep.subr.bf16.mxu1 %v8405_v29  ;;  %v287_v44 = vrot.slane %v273_v39, %v8700_v41  ;;  %v8439_v22 = vld [vmem:[%s10461_s1 + $0xe30] sm:$0xff]   ;;  %v8442_v26 = vld [vmem:[%s10461_s1 + $0xef8] sm:$0xff]  }
 0x1bb   :  { %v8440_v25 = vld [vmem:[%s10461_s1 + $0xeb0] sm:$0xff]   ;;  %v8443_v27 = vld [vmem:[%s10461_s1 + $0xe38] sm:$0xff]  }
 0x1bc   :  { %v10015_v33 = vadd.f32 %v7461_v24, %v5632_v31  ;;  %7742 = vmatpush3.bf16.msra.mxu0 %v8406_v30  ;;  %v289_v49 = vcombine.high %v287_v44, %v287_v44  ;;  %v484_v51 = vpack.c.bf16 %v287_v44, %v287_v44  ;;  %v8441_v24 = vld [vmem:[%s10461_s1 + $0xe78] sm:$0xff]   ;;  %v30_v28 = vld [vmem:[%s10460_s0 + $0x70] sm:$0xff]  ;;  %v8446_v31 = vld [vmem:[%s10461_s1 + $0xf40] sm:$0xff]  }
 0x1bd   :  { %7743 = vmatprep.subr.bf16.mxu0 %v8408_v32  ;;  %7764 = vmatpush3.bf16.msra.mxu1 %v8407_v34  ;;  %v297_v29 = vrot.slane %v30_v28, %v8700_v41  ;;  %v290_v30 = vcombine.high %v30_v28, %v30_v28  ;;  %v8444_v32 = vld [vmem:[%s10461_s1 + $0xeb8] sm:$0xff]   ;;  %v8481_v28 = vld [vmem:[%s10461_s1 + $0x1000] sm:$0xff]  }
 0x1be   :  { %7765 = vmatprep.subr.bf16.mxu1 %v8409_v35  ;;  %v485_v53 = vpack.c.bf16 %v289_v49, %v289_v49  ;;  %v8447_v35 = vld [vmem:[%s10461_s1 + $0xfc0] sm:$0xff]   ;;  %v8455_v49 = vld [vmem:[%s10461_s1 + $0xfd0] sm:$0xff]  }
 0x1bf   :  { %v304_v34 = vrot.slane %v290_v30, %v8700_v41 }
 0x1c0   :  { %7744 = vmatpush3.bf16.msra.mxu0 %v8410_v36  ;;  %6229 = vmatprep.mubr.bf16.mxu1 %v485_v53  ;;  %v486_v36 = vpack.c.bf16 %v297_v29, %v297_v29  ;;  %v8459_v53 = vld [vmem:[%s10461_s1 + $0xfd8] sm:$0xff]  }
 0x1c1   :  { %7773 = vmatprep.subr.bf16.mxu0 %v8413_v40  ;;  %7766 = vmatpush3.bf16.msra.mxu1 %v8411_v42  ;;  %v306_v39 = vcombine.high %v304_v34, %v304_v34  ;;  %v8449_v40 = vld [vmem:[%s10461_s1 + $0xf80] sm:$0xff]   ;;  %v488_v42 = vpack.c.bf16 %v304_v34, %v304_v34 }
 0x1c2   :  { %7795 = vmatprep.subr.bf16.mxu1 %v8414_v45  ;;  %v8451_v45 = vld [vmem:[%s10461_s1 + $0xfc8] sm:$0xff]  }
 0x1c3   :  { %6190 = vmatmul.mubr.bf16.vlgmr.msra.gmra.mrb[52].mxu0 %v482_v46  ;;  %v489_v44 = vpack.c.bf16 %v306_v39, %v306_v39  ;;  %v8452_v46 = vld [vmem:[%s10461_s1 + $0xf08] sm:$0xff]   ;;  %v8488_v39 = vld [vmem:[%s10461_s1 + $0x10d0] sm:$0xff]  }
 0x1c4   :  { %7774 = vmatpush3.bf16.msra.mxu0 %v8415_v47  ;;  %6230 = vmatmul.mubr.bf16.vlgmr.msra.gmra.mrb[52].mxu1 %v484_v51  ;;  %v8453_v47 = vld [vmem:[%s10461_s1 + $0xf88] sm:$0xff]   ;;  %v8457_v51 = vld [vmem:[%s10461_s1 + $0xf90] sm:$0xff]  }
 0x1c5   :  { %7775 = vmatprep.subr.bf16.mxu0 %v8417_v52  ;;  %7796 = vmatpush3.bf16.msra.mxu1 %v8416_v50  ;;  %v8456_v50 = vld [vmem:[%s10461_s1 + $0xf10] sm:$0xff]   ;;  %v8458_v52 = vld [vmem:[%s10461_s1 + $0xf58] sm:$0xff]  }
 0x1c6   :  { %7797 = vmatprep.subr.bf16.mxu1 %v8418_v54  ;;  %6309 = vmatprep.mubr.bf16.mxu1 %v489_v44  ;;  %v8460_v54 = vld [vmem:[%s10461_s1 + $0xf18] sm:$0xff]  }
 0x1c7   :  { %v8492_v44 = vld [vmem:[%s10461_s1 + $0x10d8] sm:$0xff]  }
 0x1c8   :  { %7776 = vmatpush3.bf16.msra.mxu0 %v8419_v55  ;;  %v8461_v55 = vld [vmem:[%s10461_s1 + $0xf98] sm:$0xff]  }
 0x1c9   :  { %7777 = vmatprep.subr.bf16.mxu0 %v8421_v57  ;;  %7798 = vmatpush3.bf16.msra.mxu1 %v8420_v56  ;;  %v8462_v56 = vld [vmem:[%s10461_s1 + $0xf60] sm:$0xff]  }
 0x1ca   :  { %7799 = vmatprep.subr.bf16.mxu1 %v8422_v58  ;;  %v8463_v57 = vld [vmem:[%s10461_s1 + $0xfe0] sm:$0xff]  }
 0x1cb   :  { %v8464_v58 = vld [vmem:[%s10461_s1 + $0xf20] sm:$0xff]  }
 0x1cc   :  { %7778 = vmatpush3.bf16.msra.mxu0 %v8423_v59  ;;  %v8465_v59 = vld [vmem:[%s10461_s1 + $0xfa0] sm:$0xff]  }
 0x1cd   :  { %7779 = vmatprep.subr.bf16.mxu0 %v8425_v61  ;;  %7800 = vmatpush3.bf16.msra.mxu1 %v8424_v60  ;;  %v8466_v60 = vld [vmem:[%s10461_s1 + $0xf68] sm:$0xff]  }
 0x1ce   :  { %7801 = vmatprep.subr.bf16.mxu1 %v8426_v62 }
 0x1d0   :  { %7780 = vmatpush3.bf16.msra.mxu0 %v8427_v63  ;;  %v8467_v63 = vld [vmem:[%s10461_s1 + $0xfe8] sm:$0xff]  }
 0x1d1   :  { %7781 = vmatprep.subr.bf16.mxu0 %v8429_v1  ;;  %7802 = vmatpush3.bf16.msra.mxu1 %v8428_v0  ;;  %v8468_v0 = vld [vmem:[%s10461_s1 + $0xf28] sm:$0xff]  }
 0x1d2   :  { %7803 = vmatprep.subr.bf16.mxu1 %v8430_v2 }
 0x1d4   :  { %7782 = vmatpush3.bf16.msra.mxu0 %v8431_v3 }
 0x1d5   :  { %7783 = vmatprep.subr.bf16.mxu0 %v8433_v5  ;;  %7804 = vmatpush3.bf16.msra.mxu1 %v8432_v4 }
 0x1d6   :  { %v7481_v7 = vpop.f32.mrb[28].mxu0  ;;  %7805 = vmatprep.subr.bf16.mxu1 %v8434_v6 }
 0x1d7   :  { %v7503_v8 = vpop.f32.mrb[28].mxu1  ;;  %v7482_v11 = vpop.f32.mrb[29].mxu0 }
 0x1d8   :  { %v7504_v12 = vpop.f32.mrb[29].mxu1  ;;  %v7483_v13 = vadd.f32 %v7482_v11, %v7481_v7  ;;  %v7484_v15 = vpop.f32.mrb[30].mxu0  ;;  %7784 = vmatpush3.bf16.msra.mxu0 %v8435_v9  ;;  %v8469_v7 = vld [vmem:[%s10461_s1 + $0xfa8] sm:$0xff]  }
 0x1d9   :  { %v7505_v14 = vadd.f32 %v7504_v12, %v7503_v8  ;;  %v7506_v16 = vpop.f32.mrb[30].mxu1  ;;  %v7485_v18 = vpop.f32.mrb[31].mxu0  ;;  %7785 = vmatprep.subr.bf16.mxu0 %v8437_v10  ;;  %7806 = vmatpush3.bf16.msra.mxu1 %v8436_v17  ;;  %v8470_v10 = vld [vmem:[%s10461_s1 + $0xf70] sm:$0xff]   ;;  %v8474_v15 = vld [vmem:[%s10461_s1 + $0xf78] sm:$0xff]  }
 0x1da   :  { %v7507_v19 = vpop.f32.mrb[31].mxu1  ;;  %v5712_v21 = vadd.f32 %v7483_v13, %v10015_v33  ;;  %7807 = vmatprep.subr.bf16.mxu1 %v8438_v20  ;;  %v305_v33 = vcombine.high %v297_v29, %v297_v29  ;;  %v8471_v12 = vld [vmem:[%s10461_s1 + $0xff0] sm:$0xff]   ;;  %v8475_v17 = vld [vmem:[%s10461_s1 + $0xff8] sm:$0xff]  }
 0x1db   :  { %v8473_v16 = vld [vmem:[%s10461_s1 + $0xfb0] sm:$0xff]   ;;  %v8476_v18 = vld [vmem:[%s10461_s1 + $0xf38] sm:$0xff]  }
 0x1dc   :  { %v10116_v23 = vadd.f32 %v7505_v14, %v5712_v21  ;;  %7786 = vmatpush3.bf16.msra.mxu0 %v8439_v22  ;;  %v487_v38 = vpack.c.bf16 %v305_v33, %v305_v33  ;;  %v8472_v14 = vld [vmem:[%s10461_s1 + $0xf30] sm:$0xff]   ;;  %v31_v19 = vld [vmem:[%s10460_s0 + $0x78] sm:$0xff]  ;;  %v8479_v22 = vld [vmem:[%s10461_s1 + $0x1040] sm:$0xff]  }
 0x1dd   :  { %7787 = vmatprep.subr.bf16.mxu0 %v8441_v24  ;;  %7808 = vmatpush3.bf16.msra.mxu1 %v8440_v25  ;;  %v314_v20 = vrot.slane %v31_v19, %v8700_v41  ;;  %v307_v21 = vcombine.high %v31_v19, %v31_v19  ;;  %v8483_v33 = vld [vmem:[%s10461_s1 + $0x1048] sm:$0xff]  }
 0x1de   :  { %7809 = vmatprep.subr.bf16.mxu1 %v8442_v26  ;;  %6269 = vmatprep.mubr.bf16.mxu0 %v487_v38  ;;  %v8480_v26 = vld [vmem:[%s10461_s1 + $0x10c0] sm:$0xff]   ;;  %v8487_v38 = vld [vmem:[%s10461_s1 + $0x1050] sm:$0xff]  }
 0x1df   :  { %v322_v24 = vcombine.high %v314_v20, %v314_v20  ;;  %v321_v25 = vrot.slane %v307_v21, %v8700_v41  ;;  %v8514_v21 = vld [vmem:[%s10461_s1 + $0x1100] sm:$0xff]  }
 0x1e0   :  { %7788 = vmatpush3.bf16.msra.mxu0 %v8443_v27  ;;  %v490_v27 = vpack.c.bf16 %v314_v20, %v314_v20 }
 0x1e1   :  { %7817 = vmatprep.subr.bf16.mxu0 %v8446_v31  ;;  %7810 = vmatpush3.bf16.msra.mxu1 %v8444_v32  ;;  %v491_v29 = vpack.c.bf16 %v322_v24, %v322_v24  ;;  %v323_v30 = vcombine.high %v321_v25, %v321_v25  ;;  %v8482_v31 = vld [vmem:[%s10461_s1 + $0x1080] sm:$0xff]   ;;  %v492_v32 = vpack.c.bf16 %v321_v25, %v321_v25 }
 0x1e2   :  { %7839 = vmatprep.subr.bf16.mxu1 %v8447_v35  ;;  %v8484_v35 = vld [vmem:[%s10461_s1 + $0x10c8] sm:$0xff]   ;;  %v8515_v25 = vld [vmem:[%s10461_s1 + $0x1180] sm:$0xff]  }
 0x1e3   :  { %6270 = vmatmul.mubr.bf16.vlgmr.msra.gmra.mrb[56].mxu0 %v486_v36  ;;  %v493_v34 = vpack.c.bf16 %v323_v30, %v323_v30  ;;  %v8485_v36 = vld [vmem:[%s10461_s1 + $0x1008] sm:$0xff]   ;;  %v8521_v30 = vld [vmem:[%s10461_s1 + $0x11d0] sm:$0xff]  }
 0x1e4   :  { %7818 = vmatpush3.bf16.msra.mxu0 %v8448_v37  ;;  %6310 = vmatmul.mubr.bf16.vlgmr.msra.gmra.mrb[56].mxu1 %v488_v42  ;;  %v8486_v37 = vld [vmem:[%s10461_s1 + $0x1088] sm:$0xff]   ;;  %v8490_v42 = vld [vmem:[%s10461_s1 + $0x1090] sm:$0xff]  }
 0x1e5   :  { %7819 = vmatprep.subr.bf16.mxu0 %v8450_v43  ;;  %7840 = vmatpush3.bf16.msra.mxu1 %v8449_v40  ;;  %v8489_v40 = vld [vmem:[%s10461_s1 + $0x1010] sm:$0xff]   ;;  %v8491_v43 = vld [vmem:[%s10461_s1 + $0x1058] sm:$0xff]  }
 0x1e6   :  { %7841 = vmatprep.subr.bf16.mxu1 %v8451_v45  ;;  %6349 = vmatprep.mubr.bf16.mxu0 %v491_v29  ;;  %v8493_v45 = vld [vmem:[%s10461_s1 + $0x1018] sm:$0xff]   ;;  %v8519_v29 = vld [vmem:[%s10461_s1 + $0x1188] sm:$0xff]  }
 0x1e7   :  { %6389 = vmatprep.mubr.bf16.mxu1 %v493_v34  ;;  %v8525_v34 = vld [vmem:[%s10461_s1 + $0x11d8] sm:$0xff]  }
 0x1e8   :  { %7820 = vmatpush3.bf16.msra.mxu0 %v8452_v46  ;;  %v8494_v46 = vld [vmem:[%s10461_s1 + $0x1098] sm:$0xff]  }
 0x1e9   :  { %7821 = vmatprep.subr.bf16.mxu0 %v8454_v48  ;;  %7842 = vmatpush3.bf16.msra.mxu1 %v8453_v47  ;;  %v8495_v47 = vld [vmem:[%s10461_s1 + $0x1060] sm:$0xff]  }
 0x1ea   :  { %7843 = vmatprep.subr.bf16.mxu1 %v8455_v49  ;;  %v8496_v48 = vld [vmem:[%s10461_s1 + $0x10e0] sm:$0xff]  }
 0x1eb   :  { %v8497_v49 = vld [vmem:[%s10461_s1 + $0x1020] sm:$0xff]  }
 0x1ec   :  { %7822 = vmatpush3.bf16.msra.mxu0 %v8456_v50  ;;  %v8498_v50 = vld [vmem:[%s10461_s1 + $0x10a0] sm:$0xff]  }
 0x1ed   :  { %7823 = vmatprep.subr.bf16.mxu0 %v8458_v52  ;;  %7844 = vmatpush3.bf16.msra.mxu1 %v8457_v51  ;;  %v8499_v52 = vld [vmem:[%s10461_s1 + $0x1068] sm:$0xff]  }
 0x1ee   :  { %7845 = vmatprep.subr.bf16.mxu1 %v8459_v53 }
 0x1f0   :  { %7824 = vmatpush3.bf16.msra.mxu0 %v8460_v54 }
 0x1f1   :  { %7825 = vmatprep.subr.bf16.mxu0 %v8462_v56  ;;  %7846 = vmatpush3.bf16.msra.mxu1 %v8461_v55  ;;  %v8500_v55 = vld [vmem:[%s10461_s1 + $0x10e8] sm:$0xff]  }
 0x1f2   :  { %7847 = vmatprep.subr.bf16.mxu1 %v8463_v57  ;;  %v8501_v56 = vld [vmem:[%s10461_s1 + $0x1028] sm:$0xff]  }
 0x1f4   :  { %7826 = vmatpush3.bf16.msra.mxu0 %v8464_v58 }
 0x1f5   :  { %7827 = vmatprep.subr.bf16.mxu0 %v8466_v60  ;;  %7848 = vmatpush3.bf16.msra.mxu1 %v8465_v59 }
 0x1f6   :  { %v7525_v61 = vpop.f32.mrb[32].mxu0  ;;  %7849 = vmatprep.subr.bf16.mxu1 %v8467_v63 }
 0x1f7   :  { %v7547_v62 = vpop.f32.mrb[32].mxu1  ;;  %v7526_v1 = vpop.f32.mrb[33].mxu0 }
 0x1f8   :  { %v7548_v2 = vpop.f32.mrb[33].mxu1  ;;  %v7527_v3 = vadd.f32 %v7526_v1, %v7525_v61  ;;  %v7528_v5 = vpop.f32.mrb[34].mxu0  ;;  %7828 = vmatpush3.bf16.msra.mxu0 %v8468_v0  ;;  %v8503_v1 = vld [vmem:[%s10461_s1 + $0x1070] sm:$0xff]  }
 0x1f9   :  { %v7549_v4 = vadd.f32 %v7548_v2, %v7547_v62  ;;  %v7550_v6 = vpop.f32.mrb[34].mxu1  ;;  %v7529_v8 = vpop.f32.mrb[35].mxu0  ;;  %7829 = vmatprep.subr.bf16.mxu0 %v8470_v10  ;;  %7850 = vmatpush3.bf16.msra.mxu1 %v8469_v7  ;;  %v8502_v2 = vld [vmem:[%s10461_s1 + $0x10a8] sm:$0xff]   ;;  %v8505_v5 = vld [vmem:[%s10461_s1 + $0x1030] sm:$0xff]   ;;  %v32_v10 = vld [vmem:[%s10460_s0 + $0x80] sm:$0xff] }
 0x1fa   :  { %v7551_v9 = vpop.f32.mrb[35].mxu1  ;;  %v5792_v11 = vadd.f32 %v7527_v3, %v10116_v23  ;;  %7851 = vmatprep.subr.bf16.mxu1 %v8471_v12  ;;  %v8477_v23 = vld [vmem:[%s10461_s1 + $0xfb8] sm:$0xff]   ;;  %v8506_v7 = vld [vmem:[%s10461_s1 + $0x10b0] sm:$0xff]   ;;  %v324_v12 = vcombine.high %v32_v10, %v32_v10 }
 0x1fb   :  { %v8507_v6 = vld [vmem:[%s10461_s1 + $0x1078] sm:$0xff]  }
 0x1fc   :  { %v10217_v13 = vadd.f32 %v7549_v4, %v5792_v11  ;;  %7830 = vmatpush3.bf16.msra.mxu0 %v8472_v14  ;;  %v8504_v4 = vld [vmem:[%s10461_s1 + $0x10f0] sm:$0xff]   ;;  %v8508_v8 = vld [vmem:[%s10461_s1 + $0x10f8] sm:$0xff]   ;;  %v331_v11 = vrot.slane %v32_v10, %v8700_v41 }
 0x1fd   :  { %7831 = vmatprep.subr.bf16.mxu0 %v8474_v15  ;;  %7852 = vmatpush3.bf16.msra.mxu1 %v8473_v16  ;;  %v8509_v9 = vld [vmem:[%s10461_s1 + $0x1038] sm:$0xff]   ;;  %v338_v16 = vrot.slane %v324_v12, %v8700_v41 }
 0x1fe   :  { %7853 = vmatprep.subr.bf16.mxu1 %v8475_v17  ;;  %v8510_v14 = vld [vmem:[%s10461_s1 + $0x10b8] sm:$0xff]   ;;  %v339_v15 = vcombine.high %v331_v11, %v331_v11  ;;  %v8513_v17 = vld [vmem:[%s10461_s1 + $0x11c0] sm:$0xff]  }
 0x1ff   :  { %v340_v20 = vcombine.high %v338_v16, %v338_v16 }
 0x200   :  { %7832 = vmatpush3.bf16.msra.mxu0 %v8476_v18  ;;  %v494_v18 = vpack.c.bf16 %v331_v11, %v331_v11  ;;  %v495_v19 = vpack.c.bf16 %v339_v15, %v339_v15 }
 0x201   :  { %7861 = vmatprep.subr.bf16.mxu0 %v8479_v22  ;;  %7854 = vmatpush3.bf16.msra.mxu1 %v8477_v23  ;;  %v496_v22 = vpack.c.bf16 %v338_v16, %v338_v16  ;;  %v8516_v23 = vld [vmem:[%s10461_s1 + $0x1148] sm:$0xff]   ;;  %v497_v24 = vpack.c.bf16 %v340_v20, %v340_v20 }
 0x202   :  { %7883 = vmatprep.subr.bf16.mxu1 %v8480_v26  ;;  %v8517_v26 = vld [vmem:[%s10461_s1 + $0x11c8] sm:$0xff]  }
 0x203   :  { %6350 = vmatmul.mubr.bf16.vlgmr.msra.gmra.mrb[60].mxu0 %v490_v27  ;;  %v8518_v27 = vld [vmem:[%s10461_s1 + $0x1108] sm:$0xff]  }
 0x204   :  { %7862 = vmatpush3.bf16.msra.mxu0 %v8481_v28  ;;  %6390 = vmatmul.mubr.bf16.vlgmr.msra.gmra.mrb[60].mxu1 %v492_v32  ;;  %v8520_v28 = vld [vmem:[%s10461_s1 + $0x1150] sm:$0xff]   ;;  %v8524_v32 = vld [vmem:[%s10461_s1 + $0x1158] sm:$0xff]  }
 0x205   :  { %7863 = vmatprep.subr.bf16.mxu0 %v8483_v33  ;;  %7884 = vmatpush3.bf16.msra.mxu1 %v8482_v31  ;;  %v8522_v31 = vld [vmem:[%s10461_s1 + $0x1110] sm:$0xff]  }
 0x206   :  { %7885 = vmatprep.subr.bf16.mxu1 %v8484_v35  ;;  %6429 = vmatprep.mubr.bf16.mxu0 %v495_v19  ;;  %v8523_v33 = vld [vmem:[%s10461_s1 + $0x1190] sm:$0xff]   ;;  %v8526_v35 = vld [vmem:[%s10461_s1 + $0x1118] sm:$0xff]  }
 0x207   :  { %6469 = vmatprep.mubr.bf16.mxu1 %v497_v24 }
 0x208   :  { %7864 = vmatpush3.bf16.msra.mxu0 %v8485_v36  ;;  %v8528_v36 = vld [vmem:[%s10461_s1 + $0x1160] sm:$0xff]  }
 0x209   :  { %7865 = vmatprep.subr.bf16.mxu0 %v8487_v38  ;;  %7886 = vmatpush3.bf16.msra.mxu1 %v8486_v37  ;;  %v8527_v37 = vld [vmem:[%s10461_s1 + $0x1198] sm:$0xff]   ;;  %v8529_v38 = vld [vmem:[%s10461_s1 + $0x11e0] sm:$0xff]  }
 0x20a   :  { %7887 = vmatprep.subr.bf16.mxu1 %v8488_v39  ;;  %v8530_v39 = vld [vmem:[%s10461_s1 + $0x1120] sm:$0xff]  }
 0x20c   :  { %7866 = vmatpush3.bf16.msra.mxu0 %v8489_v40 }
 0x20d   :  { %7867 = vmatprep.subr.bf16.mxu0 %v8491_v43  ;;  %7888 = vmatpush3.bf16.msra.mxu1 %v8490_v42  ;;  %v8532_v43 = vld [vmem:[%s10461_s1 + $0x1168] sm:$0xff]  }
 0x20e   :  { %7889 = vmatprep.subr.bf16.mxu1 %v8492_v44  ;;  %v8531_v44 = vld [vmem:[%s10461_s1 + $0x11a0] sm:$0xff]  }
 0x210   :  { %7868 = vmatpush3.bf16.msra.mxu0 %v8493_v45 }
 0x211   :  { %7869 = vmatprep.subr.bf16.mxu0 %v8495_v47  ;;  %7890 = vmatpush3.bf16.msra.mxu1 %v8494_v46  ;;  %v8533_v47 = vld [vmem:[%s10461_s1 + $0x11e8] sm:$0xff]  }
 0x212   :  { %7891 = vmatprep.subr.bf16.mxu1 %v8496_v48 }
 0x214   :  { %7870 = vmatpush3.bf16.msra.mxu0 %v8497_v49 }
 0x215   :  { %7871 = vmatprep.subr.bf16.mxu0 %v8499_v52  ;;  %7892 = vmatpush3.bf16.msra.mxu1 %v8498_v50 }
 0x216   :  { %v7569_v51 = vpop.f32.mrb[36].mxu0  ;;  %7893 = vmatprep.subr.bf16.mxu1 %v8500_v55 }
 0x217   :  { %v7591_v53 = vpop.f32.mrb[36].mxu1  ;;  %v7570_v54 = vpop.f32.mrb[37].mxu0 }
 0x218   :  { %v7571_v57 = vadd.f32 %v7570_v54, %v7569_v51  ;;  %v7592_v58 = vpop.f32.mrb[37].mxu1  ;;  %v7572_v59 = vpop.f32.mrb[38].mxu0  ;;  %7872 = vmatpush3.bf16.msra.mxu0 %v8501_v56  ;;  %v8534_v54 = vld [vmem:[%s10461_s1 + $0x1128] sm:$0xff]   ;;  %v8536_v56 = vld [vmem:[%s10461_s1 + $0x1170] sm:$0xff]  }
 0x219   :  { %v7593_v60 = vadd.f32 %v7592_v58, %v7591_v53  ;;  %v7594_v61 = vpop.f32.mrb[38].mxu1  ;;  %v7573_v62 = vpop.f32.mrb[39].mxu0  ;;  %7873 = vmatprep.subr.bf16.mxu0 %v8503_v1  ;;  %7894 = vmatpush3.bf16.msra.mxu1 %v8502_v2  ;;  %v8535_v58 = vld [vmem:[%s10461_s1 + $0x11a8] sm:$0xff]   ;;  %v8537_v59 = vld [vmem:[%s10461_s1 + $0x11f0] sm:$0xff]  }
 0x21a   :  { %v5872_v63 = vadd.f32 %v7571_v57, %v10217_v13  ;;  %v7595_v0 = vpop.f32.mrb[39].mxu1  ;;  %7895 = vmatprep.subr.bf16.mxu1 %v8504_v4  ;;  %v8512_v13 = vld [vmem:[%s10461_s1 + $0x1140] sm:$0xff]   ;;  %v8540_v61 = vld [vmem:[%s10461_s1 + $0x1178] sm:$0xff]   ;;  %v8539_v62 = vld [vmem:[%s10461_s1 + $0x11b0] sm:$0xff]  }
 0x21b   :  { %v8542_v0 = vld [vmem:[%s10461_s1 + $0x1138] sm:$0xff]   ;;  %v33_v1 = vld [vmem:[%s10460_s0 + $0x88] sm:$0xff] }
 0x21c   :  { %v10318_v3 = vadd.f32 %v7593_v60, %v5872_v63  ;;  %7874 = vmatpush3.bf16.msra.mxu0 %v8505_v5  ;;  %v8538_v60 = vld [vmem:[%s10461_s1 + $0x1130] sm:$0xff]   ;;  %v8541_v63 = vld [vmem:[%s10461_s1 + $0x11f8] sm:$0xff]  }
 0x21d   :  { %7875 = vmatprep.subr.bf16.mxu0 %v8507_v6  ;;  %7896 = vmatpush3.bf16.msra.mxu1 %v8506_v7 }
 0x21e   :  { %7897 = vmatprep.subr.bf16.mxu1 %v8508_v8 }
 0x220   :  { %7876 = vmatpush3.bf16.msra.mxu0 %v8509_v9 }
 0x221   :  { %7905 = vmatprep.subr.bf16.mxu0 %v8512_v13  ;;  %7898 = vmatpush3.bf16.msra.mxu1 %v8510_v14 }
 0x222   :  { %7927 = vmatprep.subr.bf16.mxu1 %v8513_v17 }
 0x223   :  { %6430 = vmatmul.mubr.bf16.vlgmr.msra.gmra.mrb[64].mxu0 %v494_v18 }
 0x224   :  { %7906 = vmatpush3.bf16.msra.mxu0 %v8514_v21  ;;  %6470 = vmatmul.mubr.bf16.vlgmr.msra.gmra.mrb[64].mxu1 %v496_v22 }
 0x225   :  { %7907 = vmatprep.subr.bf16.mxu0 %v8516_v23  ;;  %7928 = vmatpush3.bf16.msra.mxu1 %v8515_v25 }
 0x226   :  { %7929 = vmatprep.subr.bf16.mxu1 %v8517_v26 }
 0x228   :  { %7908 = vmatpush3.bf16.msra.mxu0 %v8518_v27 }
 0x229   :  { %7909 = vmatprep.subr.bf16.mxu0 %v8520_v28  ;;  %7930 = vmatpush3.bf16.msra.mxu1 %v8519_v29 }
 0x22a   :  { %7931 = vmatprep.subr.bf16.mxu1 %v8521_v30 }
 0x22c   :  { %7910 = vmatpush3.bf16.msra.mxu0 %v8522_v31 }
 0x22d   :  { %7911 = vmatprep.subr.bf16.mxu0 %v8524_v32  ;;  %7932 = vmatpush3.bf16.msra.mxu1 %v8523_v33 }
 0x22e   :  { %7933 = vmatprep.subr.bf16.mxu1 %v8525_v34 }
 0x230   :  { %7912 = vmatpush3.bf16.msra.mxu0 %v8526_v35 }
 0x231   :  { %7913 = vmatprep.subr.bf16.mxu0 %v8528_v36  ;;  %7934 = vmatpush3.bf16.msra.mxu1 %v8527_v37 }
 0x232   :  { %7935 = vmatprep.subr.bf16.mxu1 %v8529_v38 }
 0x234   :  { %7914 = vmatpush3.bf16.msra.mxu0 %v8530_v39 }
 0x235   :  { %7915 = vmatprep.subr.bf16.mxu0 %v8532_v43  ;;  %7936 = vmatpush3.bf16.msra.mxu1 %v8531_v44 }
 0x236   :  { %v7613_v40 = vpop.f32.mrb[40].mxu0  ;;  %7937 = vmatprep.subr.bf16.mxu1 %v8533_v47 }
 0x237   :  { %v7614_v42 = vpop.f32.mrb[41].mxu0  ;;  %v7635_v45 = vpop.f32.mrb[40].mxu1 }
 0x238   :  { %v7615_v46 = vadd.f32 %v7614_v42, %v7613_v40  ;;  %v7616_v48 = vpop.f32.mrb[42].mxu0  ;;  %v7636_v49 = vpop.f32.mrb[41].mxu1  ;;  %7916 = vmatpush3.bf16.msra.mxu0 %v8534_v54 }
 0x239   :  { %v7617_v50 = vpop.f32.mrb[43].mxu0  ;;  %v7637_v52 = vadd.f32 %v7636_v49, %v7635_v45  ;;  %v7638_v53 = vpop.f32.mrb[42].mxu1  ;;  %7917 = vmatprep.subr.bf16.mxu0 %v8536_v56  ;;  %7938 = vmatpush3.bf16.msra.mxu1 %v8535_v58 }
 0x23a   :  { %v5952_v51 = vadd.f32 %v7615_v46, %v10318_v3  ;;  %v7639_v55 = vpop.f32.mrb[43].mxu1  ;;  %7939 = vmatprep.subr.bf16.mxu1 %v8537_v59 }
 0x23c   :  { %v5992_v57 = vadd.f32 %v7637_v52, %v5952_v51  ;;  %7918 = vmatpush3.bf16.msra.mxu0 %v8538_v60 }
 0x23d   :  { %8 = vsyncpa [#allocation3], 0  ;;  %7919 = vmatprep.subr.bf16.mxu0 %v8540_v61  ;;  %v348_v2 = vrot.slane %v33_v1, %v8700_v41  ;;  %v341_v3 = vcombine.high %v33_v1, %v33_v1  ;;  %7940 = vmatpush3.bf16.msra.mxu1 %v8539_v62  ;;  %v8543_v4 = vld [vmem:[%s10461_s1 + $0x11b8] sm:$0xff]   ;;  %s8574_s0 = smov [#allocation2]   ;;  %vm6563_vm0 = vcmask 9216  }
 0x23e   :  { %7941 = vmatprep.subr.bf16.mxu1 %v8541_v63  ;;  %s6571_s1 = sshll.u32 %s8574_s0, 4  ;;  %s6572_s1 = int_to_ptr.vmem [resolvable:$true] %s6571_s1 }
 0x23f   :  { %v356_v5 = vcombine.high %v348_v2, %v348_v2  ;;  %v355_v6 = vrot.slane %v341_v3, %v8700_v41  ;;  %v498_v7 = vpack.c.bf16 %v348_v2, %v348_v2  ;;  %s8549_s17 = scalar_lea.vmem %s6572_s1, 32  ;;  %p8554_p1 = scmp.lt.s32.totalorder %s6572_s1, %s6572_s1 }
 0x240   :  { %7920 = vmatpush3.bf16.msra.mxu0 %v8542_v0  ;;  %p8550_p0 = scmp.ne.s32.totalorder %s6572_s1, %s8549_s17  ;;  %p8555_p2 = scmp.lt.s32.totalorder %s8549_s17, %s8549_s17 }
 0x241   :  { %v499_v8 = vpack.c.bf16 %v356_v5, %v356_v5  ;;  %v357_v9 = vcombine.high %v355_v6, %v355_v6  ;;  %7942 = vmatpush3.bf16.msra.mxu1 %v8543_v4  ;;  %v500_v10 = vpack.c.bf16 %v355_v6, %v355_v6 }
 0x242   :  { %p8556_p3 = por %p8555_p2, %p8554_p1 }
 0x243   :  { %6509 = vmatprep.mubr.bf16.mxu0 %v499_v8  ;;  %v501_v11 = vpack.c.bf16 %v357_v9, %v357_v9 }
 0x244   :  { %6510 = vmatmul.mubr.bf16.vlgmr.msra.gmra.mrb[68].mxu0 %v498_v7  ;;  %p8557_p4 = pnand %p8556_p3, %p8550_p0 }
 0x245   :  { %6549 = vmatprep.mubr.bf16.mxu1 %v501_v11 }
 0x246   :  { %6550 = vmatmul.mubr.bf16.vlgmr.msra.gmra.mrb[68].mxu1 %v500_v10 }
 0x256   :  { %v7657_v12 = vpop.f32.mrb[44].mxu0 }
 0x257   :  { %v7658_v13 = vpop.f32.mrb[45].mxu0  ;;  %v7679_v14 = vpop.f32.mrb[44].mxu1 }
 0x258   :  { %v7659_v15 = vadd.f32 %v7658_v13, %v7657_v12  ;;  %v7660_v16 = vpop.f32.mrb[46].mxu0  ;;  %v7680_v17 = vpop.f32.mrb[45].mxu1 }
 0x259   :  { %v7661_v18 = vpop.f32.mrb[47].mxu0  ;;  %v7681_v41 = vadd.f32 %v7680_v17, %v7679_v14  ;;  %v7682_v20 = vpop.f32.mrb[46].mxu1 }
 0x25a   :  { %v6032_v19 = vadd.f32 %v7659_v15, %v5992_v57  ;;  %v7683_v21 = vpop.f32.mrb[47].mxu1 }
 0x25c   :  { %v6072_v22 = vadd.f32 %v7681_v41, %v6032_v19 }
 0x276   :  { %v7701_v23 = vpop.f32.mrb[48].mxu0 }
 0x277   :  { %v7702_v24 = vpop.f32.mrb[49].mxu0  ;;  %v7723_v25 = vpop.f32.mrb[48].mxu1 }
 0x278   :  { %v7703_v26 = vadd.f32 %v7702_v24, %v7701_v23  ;;  %v7704_v27 = vpop.f32.mrb[50].mxu0  ;;  %v7724_v28 = vpop.f32.mrb[49].mxu1 }
 0x279   :  { %v7705_v29 = vpop.f32.mrb[51].mxu0  ;;  %v7725_v31 = vadd.f32 %v7724_v28, %v7723_v25  ;;  %v7726_v32 = vpop.f32.mrb[50].mxu1 }
 0x27a   :  { %v6112_v30 = vadd.f32 %v7703_v26, %v6072_v22  ;;  %v7727_v33 = vpop.f32.mrb[51].mxu1 }
 0x27c   :  { %v6152_v34 = vadd.f32 %v7725_v31, %v6112_v30 }
 0x296   :  { %v7745_v35 = vpop.f32.mrb[52].mxu0 }
 0x297   :  { %v7746_v36 = vpop.f32.mrb[53].mxu0  ;;  %v7767_v37 = vpop.f32.mrb[52].mxu1 }
 0x298   :  { %v7747_v38 = vadd.f32 %v7746_v36, %v7745_v35  ;;  %v7748_v39 = vpop.f32.mrb[54].mxu0  ;;  %v7768_v40 = vpop.f32.mrb[53].mxu1 }
 0x299   :  { %v7749_v42 = vpop.f32.mrb[55].mxu0  ;;  %v7769_v44 = vadd.f32 %v7768_v40, %v7767_v37  ;;  %v7770_v45 = vpop.f32.mrb[54].mxu1 }
 0x29a   :  { %v6192_v43 = vadd.f32 %v7747_v38, %v6152_v34  ;;  %v7771_v46 = vpop.f32.mrb[55].mxu1 }
 0x29c   :  { %v6232_v47 = vadd.f32 %v7769_v44, %v6192_v43 }
 0x2b6   :  { %v7789_v48 = vpop.f32.mrb[56].mxu0 }
 0x2b7   :  { %v7790_v49 = vpop.f32.mrb[57].mxu0  ;;  %v7811_v50 = vpop.f32.mrb[56].mxu1 }
 0x2b8   :  { %v7791_v51 = vadd.f32 %v7790_v49, %v7789_v48  ;;  %v7792_v52 = vpop.f32.mrb[58].mxu0  ;;  %v7812_v53 = vpop.f32.mrb[57].mxu1 }
 0x2b9   :  { %v7793_v54 = vpop.f32.mrb[59].mxu0  ;;  %v7813_v56 = vadd.f32 %v7812_v53, %v7811_v50  ;;  %v7814_v57 = vpop.f32.mrb[58].mxu1 }
 0x2ba   :  { %v6272_v55 = vadd.f32 %v7791_v51, %v6232_v47  ;;  %v7815_v58 = vpop.f32.mrb[59].mxu1 }
 0x2bc   :  { %v6312_v59 = vadd.f32 %v7813_v56, %v6272_v55 }
 0x2d6   :  { %v7833_v60 = vpop.f32.mrb[60].mxu0 }
 0x2d7   :  { %v7834_v61 = vpop.f32.mrb[61].mxu0  ;;  %v7855_v62 = vpop.f32.mrb[60].mxu1 }
 0x2d8   :  { %v7835_v63 = vadd.f32 %v7834_v61, %v7833_v60  ;;  %v7836_v0 = vpop.f32.mrb[62].mxu0  ;;  %v7856_v1 = vpop.f32.mrb[61].mxu1 }
 0x2d9   :  { %v7837_v2 = vpop.f32.mrb[63].mxu0  ;;  %v7857_v4 = vadd.f32 %v7856_v1, %v7855_v62  ;;  %v7858_v5 = vpop.f32.mrb[62].mxu1 }
 0x2da   :  { %v6352_v3 = vadd.f32 %v7835_v63, %v6312_v59  ;;  %v7859_v6 = vpop.f32.mrb[63].mxu1 }
 0x2dc   :  { %v6392_v7 = vadd.f32 %v7857_v4, %v6352_v3 }
 0x2f6   :  { %v7877_v8 = vpop.f32.mrb[64].mxu0 }
 0x2f7   :  { %v7878_v9 = vpop.f32.mrb[65].mxu0  ;;  %v7899_v10 = vpop.f32.mrb[64].mxu1 }
 0x2f8   :  { %v7879_v11 = vadd.f32 %v7878_v9, %v7877_v8  ;;  %v7880_v12 = vpop.f32.mrb[66].mxu0  ;;  %v7900_v13 = vpop.f32.mrb[65].mxu1 }
 0x2f9   :  { %v7881_v14 = vpop.f32.mrb[67].mxu0  ;;  %v7901_v16 = vadd.f32 %v7900_v13, %v7899_v10  ;;  %v7902_v17 = vpop.f32.mrb[66].mxu1 }
 0x2fa   :  { %v6432_v15 = vadd.f32 %v7879_v11, %v6392_v7  ;;  %v7903_v18 = vpop.f32.mrb[67].mxu1 }
 0x2fc   :  { %v6472_v19 = vadd.f32 %v7901_v16, %v6432_v15 }
 0x317   :  { %v7921_v41 = vpop.f32.mrb[68].mxu0 }
 0x318   :  { %v7922_v20 = vpop.f32.mrb[69].mxu0 }
 0x319   :  { %v7943_v21 = vpop.f32.mrb[68].mxu1  ;;  %v7923_v22 = vadd.f32 %v7922_v20, %v7921_v41  ;;  %v7924_v23 = vpop.f32.mrb[70].mxu0 }
 0x31a   :  { %v7944_v24 = vpop.f32.mrb[69].mxu1  ;;  %v7925_v25 = vpop.f32.mrb[71].mxu0 }
 0x31b   :  { %v6512_v26 = vadd.f32 %v7923_v22, %v6472_v19  ;;  %v7945_v27 = vadd.f32 %v7944_v24, %v7943_v21  ;;  %v7946_v28 = vpop.f32.mrb[70].mxu1 }
 0x31c   :  { %v7947_v29 = vpop.f32.mrb[71].mxu1 }
 0x31d   :  { %v6552_v30 = vadd.f32 %v7945_v27, %v6512_v26 }
 0x31f   :  { %v7156_v31 = vmul.f32 -1.442695, %v6552_v30 }
 0x321   :  { %8545 = vpow2.f32 %v7156_v31 }
 0x32b   :  { %v8546_v32 = vpop.eup %8545 }
 0x32c   :  { %v6560_v33 = vadd.f32 1.0, %v8546_v32 }
 0x32e   :  { %8547 = vrcp.f32 %v6560_v33 }
 0x338   :  { %v8548_v34 = vpop.eup %8547 }
 0x339   :  { %6564 = vst.msk [vmem:[#allocation2] sm:$0x3] %vm6563_vm0, %v8548_v34 }
 0x33a   :  { %8560 = shalt.err (!%p8557_p4)
}
 0x33b   :  { %s8561_s2 = scalar_lea.hbm %s10463_s3, 32 }
 0x33c   :  { %p8562_p5 = scmp.ne.s32.totalorder %s10463_s3, %s8561_s2  ;;  %p8565_p6 = scmp.lt.u32.totalorder %s8561_s2, %s10463_s3 }
 0x33e   :  { %p8567_p7 = pnand %p8565_p6, %p8562_p5 }
 0x340   :  { %8570 = shalt.err (!%p8567_p7)
}
 0x341   :  { %6574 = dma.vmem_to_hbm [thread:$0]  %s6572_s1, 32, %s10463_s3, [#allocation3]  }
 0x342   :  { %8571 = dma.done.wait [#allocation3], 32  }
 0x343   :  { %8572 = vsyncadd [#allocation3], 4294967264 }
 0x344   :  { %6578 = vsyncpa [#allocation3], 1 }

</bundles_post_ra>
